<compile_context>
chip_gen: v7x
topology: tpu7x:2x2x1
jax: 0.10.0
libtpu: 0.0.40
codegen_flags: <defaults>
</compile_context>

<pallas_src>
import math
from functools import partial

import jax
import jax.numpy as jnp
from jax.experimental import pallas as pl
from jax.experimental.pallas import tpu as pltpu


def _round_up(v, m):
    return ((v + m - 1) // m) * m


def _modconv_kernel(x_ref, w_ref, o_ref, acc_ref, *, ksize, wpad, m_rows):
    # x_ref:   (1, L_pad, tk)     bf16  padded, channels-last, spatially flattened input
    # w_ref:   (1, K*K, tk, tn)   bf16  per-sample modulated weights, one (tk,tn) slab per tap
    # o_ref:   (1, m_rows, tn)    f32   conv output at padded width (wrapper crops)
    # acc_ref: (m_rows, tn)       f32   accumulator across the Cin (k) grid axis
    k = pl.program_id(2)

    @pl.when(k == 0)
    def _init():
        acc_ref[...] = jnp.zeros_like(acc_ref)

    xv = x_ref[0]                                # (L_pad, tk); loaded once per grid step
    contrib = None
    for kh in range(ksize):                      # static unroll: K*K shifted matmuls
        for kw in range(ksize):
            off = kh * wpad + kw                 # static shift -> static slice, no im2col
            slab = xv[off:off + m_rows, :]       # (m_rows, tk)
            d = jnp.dot(slab, w_ref[0, kh * ksize + kw],
                        preferred_element_type=jnp.float32)
            contrib = d if contrib is None else contrib + d
    acc_ref[...] += contrib

    @pl.when(k == pl.num_programs(2) - 1)
    def _finalize():
        o_ref[0] = acc_ref[...].astype(o_ref.dtype)


def _modulated_weights(style, conv_weight, mod_weight, mod_bias,
                       demodulate=True, eps=1e-8, lr_mul=1.0):
    """Per-sample modulated (and demodulated) conv weights, f32.

    style:       [B, style_dim]
    conv_weight: [1, Cout, Cin, K, K]   (torch: self.weight)
    mod_weight:  [Cin, style_dim]       (EqualLinear weight)
    mod_bias:    [Cin]                  (EqualLinear bias, init=1)
    returns:     [B, Cout, Cin, K, K]
    """
    style_dim = mod_weight.shape[1]
    mod_scale = (1.0 / math.sqrt(style_dim)) * lr_mul
    s = style @ (mod_weight * mod_scale).T + mod_bias * lr_mul        # [B, Cin]

    _, Cout, Cin, K, _ = conv_weight.shape
    conv_scale = 1.0 / math.sqrt(Cin * K * K)
    w = conv_scale * conv_weight * s[:, None, :, None, None]          # [B, Cout, Cin, K, K]
    if demodulate:
        demod = jax.lax.rsqrt(jnp.sum(w * w, axis=(2, 3, 4)) + eps)   # [B, Cout]
        w = w * demod[:, :, None, None, None]
    return w


def modulated_conv2d(x, style, conv_weight, mod_weight, mod_bias,
                     *, demodulate=True, eps=1e-8):
    """x: [B, Cin, H, W] NCHW, style: [B, style_dim]. Returns [B, Cout, H, W]."""
    B, Cin, H, W = x.shape
    _, Cout, _, K, _ = conv_weight.shape
    pad = K // 2
    OH, OW = H, W                         # stride-1 'same' conv
    Hp, Wp = H + 2 * pad, W + 2 * pad
    M = OH * Wp                           # rows computed at padded width; cols >= OW cropped

    # ---- tiny per-sample weight prep (negligible glue vs. the conv itself) ----
    w = _modulated_weights(style, conv_weight, mod_weight, mod_bias,
                           demodulate=demodulate, eps=eps)            # f32
    # [B, Cout, Cin, K, K] -> [B, K*K, Cin, Cout]; pad Cout lane-dense; cast bf16
    w_t = jnp.transpose(w, (0, 3, 4, 2, 1)).reshape(B, K * K, Cin, Cout)
    Cout_p = _round_up(Cout, 128)
    w_t = jnp.pad(w_t, ((0, 0), (0, 0), (0, 0), (0, Cout_p - Cout)))
    w_t = w_t.astype(jnp.bfloat16)

    # ---- input: NCHW -> channels-last, spatial zero-pad, flatten spatial, bf16 ----
    xp = jnp.transpose(x, (0, 2, 3, 1))                               # [B, H, W, Cin]
    xp = jnp.pad(xp, ((0, 0), (pad, pad), (pad, pad), (0, 0)))        # [B, Hp, Wp, Cin]
    x_flat = xp.reshape(B, Hp * Wp, Cin)
    L_pad = _round_up(Hp * Wp + K - 1, 8)                             # room for max tap shift
    x_flat = jnp.pad(x_flat, ((0, 0), (0, L_pad - Hp * Wp), (0, 0)))
    x_flat = x_flat.astype(jnp.bfloat16)

    # ---- tiling ----
    tn = 128                                       # lane-dense output tile
    tk = 128 if (Cin % 128 == 0) else Cin          # Cin reduction tile (full if small)
    grid = (B, Cout_p // tn, Cin // tk)

    kernel = partial(_modconv_kernel, ksize=K, wpad=Wp, m_rows=M)
    out = pl.pallas_call(
        kernel,
        out_shape=jax.ShapeDtypeStruct((B, M, Cout_p), jnp.float32),
        grid=grid,
        in_specs=[
            pl.BlockSpec((1, L_pad, tk), lambda b, n, k: (b, 0, k)),      # x: reused across taps
            pl.BlockSpec((1, K * K, tk, tn), lambda b, n, k: (b, 0, k, n)),
        ],
        out_specs=pl.BlockSpec((1, M, tn), lambda b, n, k: (b, 0, n)),    # same block over k -> acc
        scratch_shapes=[pltpu.VMEM((M, tn), jnp.float32)],
        compiler_params=pltpu.CompilerParams(
            dimension_semantics=("parallel", "parallel", "arbitrary")),
    )(x_flat, w_t)

    # [B, M, Cout_p] -> [B, OH, Wp, Cout_p] -> crop padded-width cols & padded Cout -> NCHW
    out = out.reshape(B, OH, Wp, Cout_p)[:, :, :OW, :Cout]
    out = jnp.transpose(out, (0, 3, 1, 2))         # only to honor the module's NCHW contract
    return out


if __name__ == "__main__":
    key = jax.random.PRNGKey(0)
    k_x, k_style, k_w, k_mod = jax.random.split(key, 4)

    # module config: in_channel=4, out_channel=8, kernel_size=3, style_dim=32,
    #                demodulate=True, upsample=False
    B, Cin, H, W = 2, 4, 16, 16
    Cout, K, style_dim = 8, 3, 32
    demodulate, eps = True, 1e-8

    x = jax.random.normal(k_x, (B, Cin, H, W), dtype=jnp.float32)
    style = jax.random.normal(k_style, (B, style_dim), dtype=jnp.float32)
    conv_weight = jax.random.normal(k_w, (1, Cout, Cin, K, K), dtype=jnp.float32)   # ~ torch.randn
    mod_weight = jax.random.normal(k_mod, (Cin, style_dim), dtype=jnp.float32)      # lr_mul=1
    mod_bias = jnp.ones((Cin,), dtype=jnp.float32)                                  # bias_init=1

    out = modulated_conv2d(x, style, conv_weight, mod_weight, mod_bias,
                           demodulate=demodulate, eps=eps)
    out = jax.block_until_ready(out)
    assert out.shape == (B, Cout, H, W)

    # --- reference: grouped conv with the same bf16-rounded operands ---
    w_ref = _modulated_weights(style, conv_weight, mod_weight, mod_bias,
                               demodulate=demodulate, eps=eps)
    w_q = w_ref.astype(jnp.bfloat16).astype(jnp.float32)    # [B, Cout, Cin, K, K]
    x_q = x.astype(jnp.bfloat16).astype(jnp.float32)
    pad = K // 2
    ref = jnp.stack([
        jax.lax.conv_general_dilated(
            x_q[b:b + 1], w_q[b], window_strides=(1, 1),
            padding=[(pad, pad), (pad, pad)],
            dimension_numbers=("NCHW", "OIHW", "NCHW"))[0]
        for b in range(B)
    ], axis=0)

    max_err = float(jnp.max(jnp.abs(out - ref)))
    assert jnp.allclose(out, ref, atol=2e-3, rtol=2e-3), f"max abs err {max_err}"

    print("KERNEL_OK")
</pallas_src>

<mosaic_0001>
module attributes {stable_mosaic.version = 11 : i64} {
  func.func @_modconv_kernel(%arg0: i32, %arg1: i32, %arg2: i32, %arg3: memref<1x328x4xbf16, #tpu.memory_space<vmem>>, %arg4: memref<1x9x4x128xbf16, #tpu.memory_space<vmem>>, %arg5: memref<1x288x128xf32, #tpu.memory_space<vmem>>, %arg6: memref<288x128xf32, #tpu.memory_space<vmem>>) attributes {dimension_semantics = [#tpu.dimension_semantics<parallel>, #tpu.dimension_semantics<parallel>, #tpu.dimension_semantics<arbitrary>], iteration_bounds = array<i64: 2, 1, 1>, scalar_prefetch = 0 : i64, scratch_operands = 1 : i64, tpu.core_type = #tpu.core_type<tc>, window_params = [{transform_indices = @transform_0, window_bounds = array<i64: 1, 328, 4>}, {transform_indices = @transform_1, window_bounds = array<i64: 1, 9, 4, 128>}, {transform_indices = @transform_2, window_bounds = array<i64: 1, 288, 128>}]} {
    %c0_i32 = arith.constant 0 : i32
    %0 = arith.cmpi eq, %arg2, %c0_i32 : i32
    %1 = arith.extui %0 : i1 to i32
    %c0_i32_0 = arith.constant 0 : i32
    %2 = arith.cmpi ne, %1, %c0_i32_0 : i32
    scf.if %2 {
      %cst_45 = arith.constant 0.000000e+00 : f32
      %55 = vector.broadcast %cst_45 : f32 to vector<288x128xf32>
      %c0_46 = arith.constant 0 : index
      %c0_47 = arith.constant 0 : index
      %56 = vector.load %arg6[%c0_46, %c0_47] : memref<288x128xf32, #tpu.memory_space<vmem>>, vector<288x128xf32>
      tpu.vector_store %arg6[%c0_46, %c0_47], %55 {strides = array<i32>} : memref<288x128xf32, #tpu.memory_space<vmem>>, vector<288x128xf32>,
    } else {
    }
    %c0 = arith.constant 0 : index
    %c0_1 = arith.constant 0 : index
    %c0_2 = arith.constant 0 : index
    %3 = vector.load %arg3[%c0, %c0_1, %c0_2] : memref<1x328x4xbf16, #tpu.memory_space<vmem>>, vector<1x328x4xbf16>
    %4 = vector.shape_cast %3 : vector<1x328x4xbf16> to vector<328x4xbf16>
    %5 = vector.extract_strided_slice %4 {offsets = [0, 0], sizes = [288, 4], strides = [1, 1]} : vector<328x4xbf16> to vector<288x4xbf16>
    %c0_3 = arith.constant 0 : index
    %c0_4 = arith.constant 0 : index
    %c0_5 = arith.constant 0 : index
    %c0_6 = arith.constant 0 : index
    %6 = vector.load %arg4[%c0_3, %c0_4, %c0_5, %c0_6] : memref<1x9x4x128xbf16, #tpu.memory_space<vmem>>, vector<1x1x4x128xbf16>
    %7 = vector.shape_cast %6 : vector<1x1x4x128xbf16> to vector<4x128xbf16>
    %cst = arith.constant dense<0.000000e+00> : vector<288x128xf32>
    %8 = tpu.matmul %5, %7, %cst {dimension_numbers = #tpu.dot_dimension_numbers<[1], [0], [0], [1], [0, 0, 1, 1], [], []>} : vector<288x4xbf16>, vector<4x128xbf16>, vector<288x128xf32> -> vector<288x128xf32>
    %9 = vector.extract_strided_slice %4 {offsets = [1, 0], sizes = [288, 4], strides = [1, 1]} : vector<328x4xbf16> to vector<288x4xbf16>
    %c0_7 = arith.constant 0 : index
    %c1 = arith.constant 1 : index
    %c0_8 = arith.constant 0 : index
    %c0_9 = arith.constant 0 : index
    %10 = vector.load %arg4[%c0_7, %c1, %c0_8, %c0_9] : memref<1x9x4x128xbf16, #tpu.memory_space<vmem>>, vector<1x1x4x128xbf16>
    %11 = vector.shape_cast %10 : vector<1x1x4x128xbf16> to vector<4x128xbf16>
    %cst_10 = arith.constant dense<0.000000e+00> : vector<288x128xf32>
    %12 = tpu.matmul %9, %11, %cst_10 {dimension_numbers = #tpu.dot_dimension_numbers<[1], [0], [0], [1], [0, 0, 1, 1], [], []>} : vector<288x4xbf16>, vector<4x128xbf16>, vector<288x128xf32> -> vector<288x128xf32>
    %13 = arith.addf %8, %12 : vector<288x128xf32>
    %14 = vector.extract_strided_slice %4 {offsets = [2, 0], sizes = [288, 4], strides = [1, 1]} : vector<328x4xbf16> to vector<288x4xbf16>
    %c0_11 = arith.constant 0 : index
    %c2 = arith.constant 2 : index
    %c0_12 = arith.constant 0 : index
    %c0_13 = arith.constant 0 : index
    %15 = vector.load %arg4[%c0_11, %c2, %c0_12, %c0_13] : memref<1x9x4x128xbf16, #tpu.memory_space<vmem>>, vector<1x1x4x128xbf16>
    %16 = vector.shape_cast %15 : vector<1x1x4x128xbf16> to vector<4x128xbf16>
    %cst_14 = arith.constant dense<0.000000e+00> : vector<288x128xf32>
    %17 = tpu.matmul %14, %16, %cst_14 {dimension_numbers = #tpu.dot_dimension_numbers<[1], [0], [0], [1], [0, 0, 1, 1], [], []>} : vector<288x4xbf16>, vector<4x128xbf16>, vector<288x128xf32> -> vector<288x128xf32>
    %18 = arith.addf %13, %17 : vector<288x128xf32>
    %19 = vector.extract_strided_slice %4 {offsets = [18, 0], sizes = [288, 4], strides = [1, 1]} : vector<328x4xbf16> to vector<288x4xbf16>
    %c0_15 = arith.constant 0 : index
    %c3 = arith.constant 3 : index
    %c0_16 = arith.constant 0 : index
    %c0_17 = arith.constant 0 : index
    %20 = vector.load %arg4[%c0_15, %c3, %c0_16, %c0_17] : memref<1x9x4x128xbf16, #tpu.memory_space<vmem>>, vector<1x1x4x128xbf16>
    %21 = vector.shape_cast %20 : vector<1x1x4x128xbf16> to vector<4x128xbf16>
    %cst_18 = arith.constant dense<0.000000e+00> : vector<288x128xf32>
    %22 = tpu.matmul %19, %21, %cst_18 {dimension_numbers = #tpu.dot_dimension_numbers<[1], [0], [0], [1], [0, 0, 1, 1], [], []>} : vector<288x4xbf16>, vector<4x128xbf16>, vector<288x128xf32> -> vector<288x128xf32>
    %23 = arith.addf %18, %22 : vector<288x128xf32>
    %24 = vector.extract_strided_slice %4 {offsets = [19, 0], sizes = [288, 4], strides = [1, 1]} : vector<328x4xbf16> to vector<288x4xbf16>
    %c0_19 = arith.constant 0 : index
    %c4 = arith.constant 4 : index
    %c0_20 = arith.constant 0 : index
    %c0_21 = arith.constant 0 : index
    %25 = vector.load %arg4[%c0_19, %c4, %c0_20, %c0_21] : memref<1x9x4x128xbf16, #tpu.memory_space<vmem>>, vector<1x1x4x128xbf16>
    %26 = vector.shape_cast %25 : vector<1x1x4x128xbf16> to vector<4x128xbf16>
    %cst_22 = arith.constant dense<0.000000e+00> : vector<288x128xf32>
    %27 = tpu.matmul %24, %26, %cst_22 {dimension_numbers = #tpu.dot_dimension_numbers<[1], [0], [0], [1], [0, 0, 1, 1], [], []>} : vector<288x4xbf16>, vector<4x128xbf16>, vector<288x128xf32> -> vector<288x128xf32>
    %28 = arith.addf %23, %27 : vector<288x128xf32>
    %29 = vector.extract_strided_slice %4 {offsets = [20, 0], sizes = [288, 4], strides = [1, 1]} : vector<328x4xbf16> to vector<288x4xbf16>
    %c0_23 = arith.constant 0 : index
    %c5 = arith.constant 5 : index
    %c0_24 = arith.constant 0 : index
    %c0_25 = arith.constant 0 : index
    %30 = vector.load %arg4[%c0_23, %c5, %c0_24, %c0_25] : memref<1x9x4x128xbf16, #tpu.memory_space<vmem>>, vector<1x1x4x128xbf16>
    %31 = vector.shape_cast %30 : vector<1x1x4x128xbf16> to vector<4x128xbf16>
    %cst_26 = arith.constant dense<0.000000e+00> : vector<288x128xf32>
    %32 = tpu.matmul %29, %31, %cst_26 {dimension_numbers = #tpu.dot_dimension_numbers<[1], [0], [0], [1], [0, 0, 1, 1], [], []>} : vector<288x4xbf16>, vector<4x128xbf16>, vector<288x128xf32> -> vector<288x128xf32>
    %33 = arith.addf %28, %32 : vector<288x128xf32>
    %34 = vector.extract_strided_slice %4 {offsets = [36, 0], sizes = [288, 4], strides = [1, 1]} : vector<328x4xbf16> to vector<288x4xbf16>
    %c0_27 = arith.constant 0 : index
    %c6 = arith.constant 6 : index
    %c0_28 = arith.constant 0 : index
    %c0_29 = arith.constant 0 : index
    %35 = vector.load %arg4[%c0_27, %c6, %c0_28, %c0_29] : memref<1x9x4x128xbf16, #tpu.memory_space<vmem>>, vector<1x1x4x128xbf16>
    %36 = vector.shape_cast %35 : vector<1x1x4x128xbf16> to vector<4x128xbf16>
    %cst_30 = arith.constant dense<0.000000e+00> : vector<288x128xf32>
    %37 = tpu.matmul %34, %36, %cst_30 {dimension_numbers = #tpu.dot_dimension_numbers<[1], [0], [0], [1], [0, 0, 1, 1], [], []>} : vector<288x4xbf16>, vector<4x128xbf16>, vector<288x128xf32> -> vector<288x128xf32>
    %38 = arith.addf %33, %37 : vector<288x128xf32>
    %39 = vector.extract_strided_slice %4 {offsets = [37, 0], sizes = [288, 4], strides = [1, 1]} : vector<328x4xbf16> to vector<288x4xbf16>
    %c0_31 = arith.constant 0 : index
    %c7 = arith.constant 7 : index
    %c0_32 = arith.constant 0 : index
    %c0_33 = arith.constant 0 : index
    %40 = vector.load %arg4[%c0_31, %c7, %c0_32, %c0_33] : memref<1x9x4x128xbf16, #tpu.memory_space<vmem>>, vector<1x1x4x128xbf16>
    %41 = vector.shape_cast %40 : vector<1x1x4x128xbf16> to vector<4x128xbf16>
    %cst_34 = arith.constant dense<0.000000e+00> : vector<288x128xf32>
    %42 = tpu.matmul %39, %41, %cst_34 {dimension_numbers = #tpu.dot_dimension_numbers<[1], [0], [0], [1], [0, 0, 1, 1], [], []>} : vector<288x4xbf16>, vector<4x128xbf16>, vector<288x128xf32> -> vector<288x128xf32>
    %43 = arith.addf %38, %42 : vector<288x128xf32>
    %44 = vector.extract_strided_slice %4 {offsets = [38, 0], sizes = [288, 4], strides = [1, 1]} : vector<328x4xbf16> to vector<288x4xbf16>
    %c0_35 = arith.constant 0 : index
    %c8 = arith.constant 8 : index
    %c0_36 = arith.constant 0 : index
    %c0_37 = arith.constant 0 : index
    %45 = vector.load %arg4[%c0_35, %c8, %c0_36, %c0_37] : memref<1x9x4x128xbf16, #tpu.memory_space<vmem>>, vector<1x1x4x128xbf16>
    %46 = vector.shape_cast %45 : vector<1x1x4x128xbf16> to vector<4x128xbf16>
    %cst_38 = arith.constant dense<0.000000e+00> : vector<288x128xf32>
    %47 = tpu.matmul %44, %46, %cst_38 {dimension_numbers = #tpu.dot_dimension_numbers<[1], [0], [0], [1], [0, 0, 1, 1], [], []>} : vector<288x4xbf16>, vector<4x128xbf16>, vector<288x128xf32> -> vector<288x128xf32>
    %48 = arith.addf %43, %47 : vector<288x128xf32>
    %c0_39 = arith.constant 0 : index
    %c0_40 = arith.constant 0 : index
    %49 = vector.load %arg6[%c0_39, %c0_40] : memref<288x128xf32, #tpu.memory_space<vmem>>, vector<288x128xf32>
    %50 = arith.addf %49, %48 : vector<288x128xf32>
    %c0_41 = arith.constant 0 : index
    %c0_42 = arith.constant 0 : index
    %51 = vector.load %arg6[%c0_41, %c0_42] : memref<288x128xf32, #tpu.memory_space<vmem>>, vector<288x128xf32>
    tpu.vector_store %arg6[%c0_41, %c0_42], %50 {strides = array<i32>} : memref<288x128xf32, #tpu.memory_space<vmem>>, vector<288x128xf32>,
    %c0_i32_43 = arith.constant 0 : i32
    %52 = arith.cmpi eq, %arg2, %c0_i32_43 : i32
    %53 = arith.extui %52 : i1 to i32
    %c0_i32_44 = arith.constant 0 : i32
    %54 = arith.cmpi ne, %53, %c0_i32_44 : i32
    scf.if %54 {
      %c0_45 = arith.constant 0 : index
      %c0_46 = arith.constant 0 : index
      %55 = vector.load %arg6[%c0_45, %c0_46] : memref<288x128xf32, #tpu.memory_space<vmem>>, vector<288x128xf32>
      %c0_47 = arith.constant 0 : index
      %c0_48 = arith.constant 0 : index
      %c0_49 = arith.constant 0 : index
      %56 = vector.load %arg5[%c0_47, %c0_48, %c0_49] : memref<1x288x128xf32, #tpu.memory_space<vmem>>, vector<1x288x128xf32>
      %57 = vector.shape_cast %56 : vector<1x288x128xf32> to vector<288x128xf32>
      %58 = vector.shape_cast %55 : vector<288x128xf32> to vector<1x288x128xf32>
      tpu.vector_store %arg5[%c0_47, %c0_48, %c0_49], %58 {strides = array<i32>} : memref<1x288x128xf32, #tpu.memory_space<vmem>>, vector<1x288x128xf32>,
    } else {
    }
    return
  }
  func.func @transform_0(%arg0: i32, %arg1: i32, %arg2: i32) -> (i32, i32, i32) {
    %c0_i32 = arith.constant 0 : i32
    %c0_i32_0 = arith.constant 0 : i32
    return %arg0, %c0_i32, %arg2 : i32, i32, i32
  }
  func.func @transform_1(%arg0: i32, %arg1: i32, %arg2: i32) -> (i32, i32, i32, i32) {
    %c0_i32 = arith.constant 0 : i32
    %c0_i32_0 = arith.constant 0 : i32
    return %arg0, %c0_i32, %arg2, %arg1 : i32, i32, i32, i32
  }
  func.func @transform_2(%arg0: i32, %arg1: i32, %arg2: i32) -> (i32, i32, i32) {
    %c0_i32 = arith.constant 0 : i32
    %c0_i32_0 = arith.constant 0 : i32
    return %arg0, %c0_i32, %arg1 : i32, i32, i32
  }
}

</mosaic_0001>

<bundles_post_ra>
// kernel: tpu_custom_call.1
= control target key start
LH: loop header
LB: loop body
LE: loop exit
PB: predicated region body
PF: predicated region fallthrough
CT: control target
= control target key end

     0   :  { %7 = vsyncpa [#allocation4], 0  ;;  %s5659_s0 = inlined_call_operand.vmem [shape: bf16[2,328,4], index: 0, kind: input, shape index: {}]   ;;  %s5660_s1 = inlined_call_operand.vmem [shape: bf16[2,9,4,128], index: 1, kind: input, shape index: {}]   ;;  %s5661_s2 = inlined_call_operand.hbm [shape: f32[2,288,128], index: 2, kind: output, shape index: {}]  }
   0x1   :  { %9 = vsyncpa [#allocation4 + $0x1], 0  ;;  %s4607_s9 = smov 0   ;;  %s4609_s10 = smov 0  }
   0x2   :  { %s4611_s11 = smov 0   ;;  %s4613_s12 = smov 0  }
   0x3   :  { %s4615_s13 = smov 0   ;;  %s4617_s14 = smov 0  }
   0x4 LB: > { %s3409_s15 = sadd.s32 4294967295, %s4587_s14   ;;  %s3410_s16 = sadd.s32 4294967294, %s4587_s14   ;;  %s4587_s14 = sphi %s4617_s14, %s15_s14   ;;  %s4583_s13 = sphi %s4615_s13, %s5735_s13   ;;  %s4579_s12 = sphi %s4613_s12, %s5734_s12   ;;  %s4575_s11 = sphi %s4611_s11, %s5733_s11   ;;  %s4571_s10 = sphi %s4609_s10, %s5732_s10   ;;  %s4567_s9 = sphi %s4607_s9, %s5731_s9  }
   0x5   : > { %s34_s17 = sadd.s32 1, %s4583_s13  ;;  %s101_s18 = sadd.s32 1, %s4575_s11 }
   0x6   : > { %p36_p0 = scmp.ge.s32.totalorder %s34_s17, 2  ;;  %p111_p1 = scmp.ne.s32.totalorder %s4575_s11, %s4571_s10 }
   0x7   : > { %p112_p2 = scmp.eq.s32.totalorder %s3409_s15, 1  ;;  %p117_p3 = scmp.ne.s32.totalorder %s4571_s10, %s4567_s9 }
   0x8   : > { %s5737_s17 = smov (%p36_p0, %s34_s17), 0  ;;  %p118_p5 = scmp.eq.s32.totalorder %s3410_s16, 1 }
   0x9   : > { %p4647_p4 = por %p112_p2, %p111_p1  ;;  %s96_s20 = ssub.s32 %s4583_s13, %s5737_s17 }
   0xa   : > { %p3413_p6 = scmp.ge.s32.totalorder %s4587_s14, 1  ;;  %p99_p7 = scmp.eq.s32.totalorder %s96_s20, 0 }
   0xb   : > { %p4654_p8 = por %p118_p5, %p117_p3  ;;  %p161_p9 = scmp.lt.s32.totalorder %s4587_s14, 3 }
   0xc   : > { %s4660_s22 = scalar_select %p99_p7, %s4575_s11, %s101_s18  }
   0xd   : > { %p162_p10 = pnand %p3413_p6, %p161_p9 }
   0xf   : > { %165 = sbr.rel (%p162_p10) target bundleno = 594 (0x252), region = 28 }
  0x16   : > { %p197_p11 = scmp.lt.s32.totalorder %s4579_s12, 1  ;;  %vm598_vm0 = vcmask 1041408   ;;  %vm394_vm1 = vsmask.f32 7424  ;;  %vm1541_vm2 = vsmask.f32 6400 }
  0x17   : > { %vm543_vm3 = vcmask 31744   ;;  %vm1899_vm4 = vcmask 1045504   ;;  %vm2443_vm5 = vsmask.f32 5376  ;;  %vm997_vm6 = vcmask 1046528   ;;  %s194_s4 = sand.u32 1, %s4571_s10  }
  0x18   : > { %s198_s23 = scalar_select %p197_p11, %s4579_s12, 1  ;;  %vm2801_vm7 = vcmask 1044480  }
  0x19   : > { %s4425_s5 = smul.u32 288, %s194_s4 }
  0x1a   : > { %s4426_s24 = smul.u32 164, %s198_s23 }
  0x1b   : > { %s4427_s25 = smul.u32 18, %s198_s23  ;;  %s5562_s6 = scalar_lea.vmem [#allocation3], %s4425_s5 }
  0x1c   : > { %s4667_s28 = scalar_lea.vmem %s5659_s0, %s4426_s24  ;;  %s4428_s7 = smul.u32 4608, %s4579_s12 }
  0x1d   : > { %s4672_s3 = scalar_lea.vmem %s5660_s1, %s4427_s25  ;;  %v4687_v4 = vld [vmem:[%s4667_s28] sm:$0xff]   ;;  %v4690_v5 = vld [vmem:[%s4667_s28 + $0x8] sm:$0xff]   ;;  %v4694_v6 = vld [vmem:[%s4667_s28 + $0x10] sm:$0xff]   ;;  %s3307_s8 = sshll.u32 %s5562_s6, 4  ;;  %s5606_s8 = int_to_ptr.vmem [resolvable:$true] %s3307_s8 }
  0x1e   : > { %v4675_v0 = vld [vmem:[%s4672_s3 + $0x8] sm:$0x3]  ;;  %v3416_v1 = vld [vmem:[%s4672_s3 + $0x2] sm:$0x3]  ;;  %v3531_v7 = vld [vmem:[%s4672_s3 + $0xa] sm:$0x3]  ;;  %s5604_s18 = scalar_lea.hbm %s5661_s2, %s4428_s7 }
  0x1f   : > { %4419 = vmatprep.subr.msk.bf16.mxu0 %vm598_vm0, %v4675_v0  ;;  %4415 = vmatprep.subr.msk.bf16.mxu1 %vm598_vm0, %v3416_v1  ;;  %v4683_v2 = vsel %vm598_vm0, %v4675_v0, 0  ;;  %v600_v3 = vsel %vm598_vm0, %v3416_v1, 0  ;;  %v396_v8 = vshrl.u32 %v4687_v4, 16  ;;  %v398_v9 = vshll.u32 %v4687_v4, 16  ;;  %v4709_v14 = vld [vmem:[%s4667_s28 + $0x18] sm:$0xff]   ;;  %v4724_v29 = vld [vmem:[%s4667_s28 + $0x20] sm:$0xff]  }
  0x20   : > { %5695 = vst [vmem:[#allocation6_spill] sm:$0xff] %v4683_v2  ;;  %3936 = vmatpush3.bf16.msra.mxu0 %v4683_v2  ;;  %3784 = vmatpush3.bf16.msra.mxu1 %v600_v3  ;;  %v403_v10 = vshll.u32 %v4690_v5, 16  ;;  %v407_v11 = vshrl.u32 %v4690_v5, 16  ;;  %v4703_v12 = vshll.u32 %v4694_v6, 16  ;;  %v4706_v13 = vshrl.u32 %v4694_v6, 16  ;;  %v4730_v34 = vld [vmem:[%s4667_s28 + $0x28] sm:$0xff]  }
  0x21   : > { %4421 = vmatprep.subr.msk.bf16.mxu0 %vm598_vm0, %v3531_v7  ;;  %v1992_v15 = vsel %vm598_vm0, %v3531_v7, 0  ;;  %v400_v16 = vrot.slane %v398_v9, 1  ;;  %v298_v20 = vld [vmem:[%s4672_s3] sm:$0x3]  ;;  %v4717_v24 = vshll.u32 %v4709_v14, 16  ;;  %v4721_v28 = vshrl.u32 %v4709_v14, 16 }
  0x22   : > { %v405_v17 = vrot.slane %v403_v10, 1  ;;  %v1542_v18 = vrot.slane %v407_v11, 1  ;;  %v1543_v19 = vrot.slane %v403_v10, 2  ;;  %v1545_v21 = vrot.slane %v4706_v13, 1  ;;  %4416 = vmatprep.subr.msk.bf16.mxu1 %vm598_vm0, %v298_v20  ;;  %v4733_v35 = vld [vmem:[%s4667_s28 + $0x30] sm:$0xff]   ;;  %v4754_v48 = vld [vmem:[%s4667_s28 + $0x38] sm:$0xff]  }
  0x23   : > { %v1546_v22 = vrot.slane %v4703_v12, 2  ;;  %v413_v23 = vrot.slane %v4703_v12, 1  ;;  %v401_v25 = vor.u32 %v400_v16, %v396_v8  ;;  %v1550_v31 = vrot.slane %v4717_v24, 2  ;;  %v4777_v60 = vld [vmem:[%s4667_s28 + $0x40] sm:$0xff]   ;;  %s5613_s12 = scalar_lea.sflag [#allocation4], %s194_s4  ;;  %s4509_s20 = scalar_lea.vmem %s5606_s8, 4608 }
  0x24   : > { %v409_v26 = vor.u32 %v407_v11, %v405_v17  ;;  %v1544_v27 = vor.u32 %v1543_v19, %v1542_v18  ;;  %v421_v33 = vrot.slane %v4717_v24, 1  ;;  %v1549_v38 = vrot.slane %v4721_v28, 1  ;;  %v4792_v11 = vld [vmem:[%s4672_s3 + $0xc] sm:$0x3]  ;;  %p4510_p12 = scmp.ne.s32.totalorder %s5606_s8, %s4509_s20  ;;  %s4589_s23 = smov [#allocation3]  }
  0x25   : > { %v1547_v30 = vor.u32 %v1546_v22, %v1545_v21  ;;  %v417_v32 = vor.u32 %v4706_v13, %v413_v23  ;;  %v406_v36 = vsel %vm394_vm1, %v401_v25, %v405_v17  ;;  %v4739_v39 = vshll.u32 %v4724_v29, 16  ;;  %v4808_v21 = vld [vmem:[%s4667_s28 + $0x48] sm:$0xff]   ;;  %s4513_s24 = sshll.u32 %s4589_s23, 4  ;;  %s4514_s24 = int_to_ptr.vmem [resolvable:$false] %s4513_s24 }
  0x26   : > { %v414_v37 = vsel %vm394_vm1, %v409_v26, %v413_v23  ;;  %3785 = vmatprep.mubr.msk.bf16.mxu1 %vm543_vm3, %v406_v36  ;;  %v4745_v42 = vshrl.u32 %v4724_v29, 16  ;;  %v425_v43 = vor.u32 %v4721_v28, %v421_v33  ;;  %v1551_v44 = vor.u32 %v1550_v31, %v1549_v38  ;;  %v4815_v26 = vld [vmem:[%s4667_s28 + $0x50] sm:$0xff]   ;;  %p4511_p13 = pnand %p4510_p12, %p4647_p4  ;;  %s4515_s25 = scalar_lea.vmem %s4514_s24, 9216 }
  0x27   : > { %v1548_v40 = vsel %vm1541_vm2, %v1544_v27, %v1547_v30  ;;  %v422_v41 = vsel %vm394_vm1, %v417_v32, %v421_v33  ;;  %3786 = vmatmul.mubr.msk.bf16.vlgmr.msra.gmra.mrb[0].mxu1 %vm543_vm3, %v414_v37  ;;  %v1554_v45 = vrot.slane %v4739_v39, 2  ;;  %v429_v46 = vrot.slane %v4739_v39, 1  ;;  %p4516_p1 = scmp.lt.s32.totalorder %s5606_s8, %s4514_s24  ;;  %p4517_p2 = scmp.lt.s32.totalorder %s4515_s25, %s4509_s20 }
  0x28   : > { %3937 = vmatprep.mubr.msk.bf16.mxu0 %vm543_vm3, %v1548_v40  ;;  %v816_v47 = vsel %vm598_vm0, %v298_v20, 0  ;;  %3789 = vmatprep.mubr.msk.bf16.mxu1 %vm543_vm3, %v422_v41  ;;  %v1553_v49 = vrot.slane %v4745_v42, 1  ;;  %v4759_v50 = vshll.u32 %v4730_v34, 16  ;;  %v4762_v51 = vshrl.u32 %v4730_v34, 16  ;;  %p4512_p0 = pneg %p4511_p13 }
  0x29   : > { %3822 = vmatpush3.bf16.msra.mxu1 %v816_v47  ;;  %v4765_v52 = vshll.u32 %v4733_v35, 16  ;;  %v1552_v53 = vsel %vm1541_vm2, %v1547_v30, %v1551_v44  ;;  %v433_v54 = vor.u32 %v4745_v42, %v429_v46  ;;  %v4770_v55 = vshrl.u32 %v4733_v35, 16  ;;  %p4518_p3 = por %p4517_p2, %p4516_p1 }
  0x2a   : > { %3938 = vmatmul.mubr.msk.bf16.vlgmr.msra.gmra.mrb[0].mxu0 %vm543_vm3, %v1552_v53  ;;  %v1555_v56 = vor.u32 %v1554_v45, %v1553_v49  ;;  %v1557_v57 = vrot.slane %v4762_v51, 1  ;;  %v1558_v58 = vrot.slane %v4759_v50, 2  ;;  %v437_v59 = vrot.slane %v4759_v50, 1  ;;  %v4845_v53 = vld [vmem:[%s4667_s28 + $0x58] sm:$0xff]  }
  0x2b   : > { %3974 = vmatpush3.bf16.msra.mxu0 %v1992_v15  ;;  %v1561_v61 = vrot.slane %v4770_v55, 1  ;;  %v1562_v62 = vrot.slane %v4765_v52, 2  ;;  %v4782_v63 = vshll.u32 %v4754_v48, 16  ;;  %v430_v3 = vsel %vm394_vm1, %v425_v43, %v429_v46  ;;  %p4519_p5 = pnand %p4518_p3, %p4512_p0 }
  0x2c   : > { %v1556_v1 = vsel %vm1541_vm2, %v1551_v44, %v1555_v56  ;;  %v1559_v7 = vor.u32 %v1558_v58, %v1557_v57  ;;  %v438_v8 = vsel %vm394_vm1, %v433_v54, %v437_v59  ;;  %v4789_v10 = vshrl.u32 %v4754_v48, 16  ;;  %4422 = vmatprep.subr.msk.bf16.mxu0 %vm598_vm0, %v4792_v11  ;;  %v4837_v44 = vld [vmem:[%s4672_s3 + $0x4] sm:$0x3] }
  0x2d   : > { %3941 = vmatprep.mubr.msk.bf16.mxu0 %vm543_vm3, %v1556_v1  ;;  %v1563_v9 = vor.u32 %v1562_v62, %v1561_v61  ;;  %v445_v15 = vrot.slane %v4765_v52, 1  ;;  %v4796_v16 = vshll.u32 %v4777_v60, 16  ;;  %v1566_v19 = vrot.slane %v4782_v63, 2  ;;  %4417 = vmatprep.subr.msk.bf16.mxu1 %vm598_vm0, %v4837_v44 }
  0x2e   : > { %v1560_v17 = vsel %vm1541_vm2, %v1555_v56, %v1559_v7  ;;  %v1565_v18 = vrot.slane %v4789_v10, 1  ;;  %v4805_v20 = vshrl.u32 %v4777_v60, 16  ;;  %v441_v23 = vor.u32 %v4762_v51, %v437_v59 }
  0x2f   : > { %3790 = vmatmul.mubr.msk.bf16.gmra.mrb[4].mxu1 %vm543_vm3, %v430_v3  ;;  %v1564_v22 = vsel %vm1541_vm2, %v1559_v7, %v1563_v9  ;;  %v1570_v25 = vrot.slane %v4796_v16, 2  ;;  %v449_v27 = vor.u32 %v4770_v55, %v445_v15  ;;  %v453_v30 = vrot.slane %v4782_v63, 1 }
  0x30   : > { %3793 = vmatprep.mubr.msk.bf16.mxu1 %vm543_vm3, %v438_v8  ;;  %v1569_v31 = vrot.slane %v4805_v20, 1  ;;  %v1567_v32 = vor.u32 %v1566_v19, %v1565_v18  ;;  %v4823_v33 = vshll.u32 %v4808_v21, 16  ;;  %v4826_v36 = vshrl.u32 %v4808_v21, 16  ;;  %v4871_v18 = vld [vmem:[%s4667_s28 + $0x60] sm:$0xff]  }
  0x31   : > { %v446_v37 = vsel %vm394_vm1, %v441_v23, %v445_v15  ;;  %v4830_v40 = vshll.u32 %v4815_v26, 16  ;;  %v4833_v41 = vshrl.u32 %v4815_v26, 16  ;;  %v454_v43 = vsel %vm394_vm1, %v449_v27, %v453_v30  ;;  %v4867_v15 = vld [vmem:[%s4667_s28 + $0x88] sm:$0xff]  }
  0x32   : > { %3942 = vmatmul.mubr.msk.bf16.gmra.mrb[4].mxu0 %vm543_vm3, %v1560_v17  ;;  %v1571_v38 = vor.u32 %v1570_v25, %v1569_v31  ;;  %v1568_v45 = vsel %vm1541_vm2, %v1563_v9, %v1567_v32  ;;  %v461_v46 = vrot.slane %v4796_v16, 1  ;;  %v1573_v47 = vrot.slane %v4826_v36, 1 }
  0x33   : > { %3945 = vmatprep.mubr.msk.bf16.mxu0 %vm543_vm3, %v1564_v22  ;;  %v1574_v49 = vrot.slane %v4823_v33, 2  ;;  %v457_v56 = vor.u32 %v4789_v10, %v453_v30  ;;  %v1577_v57 = vrot.slane %v4833_v41, 1  ;;  %v1578_v58 = vrot.slane %v4830_v40, 2 }
  0x34   : > { %v1572_v54 = vsel %vm1541_vm2, %v1567_v32, %v1571_v38  ;;  %v465_v59 = vor.u32 %v4805_v20, %v461_v46  ;;  %v469_v61 = vrot.slane %v4823_v33, 1  ;;  %v4859_v1 = vshll.u32 %v4845_v53, 16  ;;  %v293_v32 = vld [vmem:[%s4667_s28 + $0x90] sm:$0xf] }
  0x35   : > { %v1575_v62 = vor.u32 %v1574_v49, %v1573_v47  ;;  %v4862_v3 = vshrl.u32 %v4845_v53, 16  ;;  %v462_v7 = vsel %vm394_vm1, %v457_v56, %v461_v46  ;;  %v1579_v8 = vor.u32 %v1578_v58, %v1577_v57 }
  0x36   : > { %5696 = vst [vmem:[#allocation7_spill] sm:$0xff] %v4859_v1  ;;  %v470_v9 = vsel %vm394_vm1, %v465_v59, %v469_v61  ;;  %v477_v17 = vrot.slane %v4830_v40, 1  ;;  %v1582_v23 = vrot.slane %v4859_v1, 2  ;;  %v473_v27 = vor.u32 %v4826_v36, %v469_v61 }
  0x37   : > { %3794 = vmatmul.mubr.msk.bf16.gmra.mrb[8].mxu1 %vm543_vm3, %v446_v37  ;;  %5697 = vst [vmem:[#allocation8_spill] sm:$0xff] %v4862_v3  ;;  %v1576_v19 = vsel %vm1541_vm2, %v1571_v38, %v1575_v62  ;;  %v1581_v22 = vrot.slane %v4862_v3, 1  ;;  %v1580_v25 = vsel %vm1541_vm2, %v1575_v62, %v1579_v8  ;;  %v485_v31 = vrot.slane %v4859_v1, 1  ;;  %v4884_v37 = vld [vmem:[%s4667_s28 + $0x68] sm:$0xff]  }
  0x38   : > { %3797 = vmatprep.mubr.msk.bf16.mxu1 %vm543_vm3, %v454_v43  ;;  %v481_v30 = vor.u32 %v4833_v41, %v477_v17  ;;  %v4887_v43 = vshll.u32 %v4867_v15, 16  ;;  %v4891_v38 = vshll.u32 %v4871_v18, 16  ;;  %v4897_v47 = vcombine.low %v293_v32, %v293_v32 }
  0x39   : > { %v4900_v49 = vshrl.u32 %v4867_v15, 16  ;;  %v1900_v57 = vrot.slane %v4690_v5, 2  ;;  %v1901_v58 = vrot.slane %v4694_v6, 2  ;;  %v4907_v59 = vshrl.u32 %v4871_v18, 16 }
  0x3a   : > { %3946 = vmatmul.mubr.msk.bf16.gmra.mrb[8].mxu0 %vm543_vm3, %v1568_v45  ;;  %5698 = vst [vmem:[#allocation9_spill] sm:$0xff] %v4891_v38  ;;  %v4894_v45 = vor.u32 %v1582_v23, %v1581_v22  ;;  %v5662_v46 = vrot.slane %v4887_v43, 1  ;;  %5700 = vst [vmem:[#allocation11_spill] sm:$0xff] %v4897_v47  ;;  %v486_v56 = vsel %vm394_vm1, %v481_v30, %v485_v31  ;;  %v4910_v61 = vshll.u32 %v4884_v37, 16 }
  0x3b   : > { %3949 = vmatprep.mubr.msk.bf16.mxu0 %vm543_vm3, %v1572_v54  ;;  %5701 = vst [vmem:[#allocation12_spill] sm:$0xff] %v4900_v49  ;;  %v478_v54 = vsel %vm394_vm1, %v473_v27, %v477_v17  ;;  %5702 = vst [vmem:[#allocation13_spill] sm:$0xff] %v4907_v59  ;;  %v493_v17 = vrot.slane %v4891_v38, 1  ;;  %v1902_v23 = vsel %vm1899_vm4, %v1900_v57, %v1901_v58  ;;  %v4973_v38 = vld [vmem:[%s4672_s3 + $0xe] sm:$0x3]  ;;  %v5712_v1 = vrot.slane %v4887_v43, 1 }
  0x3c   : > { %5699 = vst [vmem:[#allocation10_spill] sm:$0xff] %v4894_v45  ;;  %5703 = vst [vmem:[#allocation14_spill] sm:$0xff] %v4910_v61  ;;  %v537_v62 = vor.u32 %v4900_v49, %v5662_v46  ;;  %v501_v30 = vrot.slane %v4910_v61, 1  ;;  %v4943_v46 = vshrl.u32 %v4884_v37, 16 }
  0x3d   : > { %v497_v27 = vor.u32 %v4907_v59, %v493_v17 }
  0x3e   : > { %5705 = vst [vmem:[#allocation16_spill] sm:$0xff] %v4943_v46  ;;  %v505_v2 = vor.u32 %v4943_v46, %v501_v30 }
  0x3f   : > { %3798 = vmatmul.mubr.msk.bf16.gmra.mrb[12].mxu1 %vm543_vm3, %v462_v7  ;;  %v539_v7 = vshll.u32 %v4897_v47, 16  ;;  %v2452_v47 = vrot.slane %v4739_v39, 3  ;;  %v1915_v39 = vrot.slane %v4808_v21, 2 }
  0x40   : > { %3801 = vmatprep.mubr.msk.bf16.mxu1 %vm543_vm3, %v470_v9  ;;  %v1584_v9 = vsel %vm1541_vm2, %v1579_v8, %v4894_v45  ;;  %v4959_v45 = vld [vmem:[%s4667_s28 + $0x80] sm:$0xff]  }
  0x41   : > { %v541_v22 = vrot.slane %v539_v7, 1  ;;  %v1905_v7 = vrot.slane %v4724_v29, 2 }
  0x42   : > { %3950 = vmatmul.mubr.msk.bf16.gmra.mrb[12].mxu0 %vm543_vm3, %v1576_v19  ;;  %v4921_v19 = vld [vmem:[%s4667_s28 + $0x70] sm:$0xff]  }
  0x43   : > { %3953 = vmatprep.mubr.msk.bf16.mxu0 %vm543_vm3, %v1580_v25  ;;  %v489_v25 = vor.u32 %v4862_v3, %v485_v31  ;;  %v4932_v8 = vsel %vm394_vm1, %v537_v62, %v541_v22  ;;  %v4938_v57 = vshll.u32 %v4921_v19, 16  ;;  %v502_v62 = vsel %vm394_vm1, %v497_v27, %v501_v30 }
  0x44   : > { %v4947_v22 = vshrl.u32 %v4921_v19, 16  ;;  %v2226_v27 = vsel %vm598_vm0, %v4792_v11, 0  ;;  %v296_v11 = vld [vmem:[%s4667_s28 + $0x9c] sm:$0xf]  ;;  %v1907_v30 = vrot.slane %v4730_v34, 2  ;;  %v2451_v3 = vrot.slane %v4745_v42, 2 }
  0x45   : > { %5704 = vst [vmem:[#allocation15_spill] sm:$0xff] %v4938_v57  ;;  %v494_v31 = vsel %vm394_vm1, %v489_v25, %v493_v17  ;;  %v509_v25 = vrot.slane %v4938_v57, 1  ;;  %v4978_v57 = vld [vmem:[%s4667_s28 + $0x98] sm:$0xf]  ;;  %v2455_v42 = vrot.slane %v4762_v51, 2 }
  0x46   : > { %5706 = vst [vmem:[#allocation17_spill] sm:$0xff] %v4947_v22 }
  0x47   : > { %3802 = vmatmul.mubr.msk.bf16.gmra.mrb[16].mxu1 %vm543_vm3, %v478_v54  ;;  %v4929_v54 = vld [vmem:[%s4667_s28 + $0x78] sm:$0xff]   ;;  %v513_v61 = vor.u32 %v4947_v22, %v509_v25  ;;  %v4999_v22 = vshrl.u32 %v4959_v45, 16 }
  0x48   : > { %3805 = vmatprep.mubr.msk.bf16.mxu1 %vm543_vm3, %v486_v56  ;;  %v1903_v56 = vrot.slane %v4709_v14, 2 }
  0x49   : > { %5711 = vst [vmem:[#allocation22_spill] sm:$0xff] %v4999_v22 }
  0x4a   : > { %3954 = vmatmul.mubr.msk.bf16.gmra.mrb[16].mxu0 %vm543_vm3, %v1584_v9  ;;  %v4950_v9 = vshll.u32 %v4929_v54, 16  ;;  %v4955_v17 = vsel %vm1899_vm4, %v1901_v58, %v1903_v56  ;;  %v4965_v49 = vsel %vm1899_vm4, %v1903_v56, %v1905_v7  ;;  %v4985_v56 = vshll.u32 %v4959_v45, 16 }
  0x4b   : > { %3975 = vmatprep.mubr.msk.bf16.mxu0 %vm543_vm3, %v1902_v23  ;;  %v294_v23 = vld [vmem:[%s4667_s28 + $0x94] sm:$0xf] }
  0x4c   : > { %5707 = vst [vmem:[#allocation18_spill] sm:$0xff] %v4950_v9  ;;  %v4970_v58 = vcombine.low %v293_v32, %v294_v23  ;;  %5709 = vst [vmem:[#allocation20_spill] sm:$0xff] %v4985_v56  ;;  %v4988_v32 = vcombine.low %v4978_v57, %v296_v11  ;;  %v1909_v23 = vrot.slane %v4733_v35, 2 }
  0x4e   : > { %5708 = vst [vmem:[#allocation19_spill] sm:$0xff] %v4970_v58  ;;  %v5002_v46 = vrot.slane %v4970_v58, 2  ;;  %v5685_v11 = vrot.slane %v4988_v32, 2  ;;  %v5018_v58 = vsel %vm1899_vm4, %v1907_v30, %v1909_v23 }
  0x4f   : > { %3806 = vmatmul.mubr.msk.bf16.gmra.mrb[20].mxu1 %vm543_vm3, %v494_v31  ;;  %v517_v31 = vrot.slane %v4950_v9, 1  ;;  %v4993_v9 = vshrl.u32 %v4929_v54, 16 }
  0x50   : > { %3809 = vmatprep.mubr.msk.bf16.mxu1 %vm543_vm3, %v502_v62  ;;  %v510_v62 = vsel %vm394_vm1, %v505_v2, %v509_v25  ;;  %v5007_v2 = vsel %vm1899_vm4, %v1905_v7, %v1907_v30  ;;  %v525_v25 = vrot.slane %v4985_v56, 1  ;;  %v2444_v7 = vrot.slane %v4706_v13, 2 }
  0x51   : > { %5710 = vst [vmem:[#allocation21_spill] sm:$0xff] %v4993_v9  ;;  %v521_v59 = vor.u32 %v4993_v9, %v517_v31  ;;  %v2445_v56 = vrot.slane %v4703_v12, 3  ;;  %v2448_v30 = vrot.slane %v4717_v24, 3 }
  0x52   : > { %3976 = vmatmul.mubr.msk.bf16.vlgmr.msra.gmra.mrb[0].mxu0 %vm543_vm3, %v4955_v17 }
  0x53   : > { %4012 = vmatpush3.bf16.msra.mxu0 %v2226_v27  ;;  %3979 = vmatprep.mubr.msk.bf16.mxu0 %vm543_vm3, %v4965_v49  ;;  %v518_v27 = vsel %vm394_vm1, %v513_v61, %v517_v31  ;;  %v5014_v61 = vsel %vm1899_vm4, %v5002_v46, %v5685_v11  ;;  %v1911_v11 = vrot.slane %v4754_v48, 2  ;;  %v526_v31 = vsel %vm394_vm1, %v521_v59, %v525_v25 }
  0x54   : > { %4423 = vmatprep.subr.msk.bf16.mxu0 %vm598_vm0, %v4973_v38  ;;  %v2446_v9 = vor.u32 %v2445_v56, %v2444_v7  ;;  %v2453_v59 = vor.u32 %v2452_v47, %v2451_v3  ;;  %v2456_v3 = vrot.slane %v4759_v50, 3  ;;  %v1917_v47 = vrot.slane %v4815_v26, 2 }
  0x55   : > { %v1921_v7 = vrot.slane %v4871_v18, 2 }
  0x56   : > { %v5073_v50 = vsel %vm1899_vm4, %v1915_v39, %v1917_v47 }
  0x57   : > { %3810 = vmatmul.mubr.msk.bf16.gmra.mrb[24].mxu1 %vm543_vm3, %v510_v62  ;;  %v529_v62 = vor.u32 %v4999_v22, %v525_v25  ;;  %v1913_v22 = vrot.slane %v4777_v60, 2 }
  0x58   : > { %3813 = vmatprep.mubr.msk.bf16.mxu1 %vm543_vm3, %v518_v27  ;;  %v2447_v27 = vrot.slane %v4721_v28, 2  ;;  %v5040_v28 = vsel %vm1899_vm4, %v1909_v23, %v1911_v11  ;;  %v2459_v23 = vrot.slane %v4770_v55, 2  ;;  %v2463_v55 = vrot.slane %v4789_v10, 2 }
  0x59   : > { %v534_v13 = vsel %vm394_vm1, %v529_v62, %v5712_v1  ;;  %v5047_v56 = vsel %vm1899_vm4, %v1911_v11, %v1913_v22  ;;  %v2460_v11 = vrot.slane %v4765_v52, 3  ;;  %v5065_v25 = vsel %vm1899_vm4, %v1913_v22, %v1915_v39 }
  0x5a   : > { %3980 = vmatmul.mubr.msk.bf16.gmra.mrb[4].mxu0 %vm543_vm3, %v5007_v2  ;;  %v2449_v12 = vor.u32 %v2448_v30, %v2447_v27  ;;  %v1919_v22 = vrot.slane %v4845_v53, 2  ;;  %v1090_v30 = vsel %vm598_vm0, %v4837_v44, 0  ;;  %v2472_v39 = vrot.slane %v4823_v33, 3 }
  0x5b   : > { %3983 = vmatprep.mubr.msk.bf16.mxu0 %vm543_vm3, %v5018_v58  ;;  %v2461_v51 = vor.u32 %v2460_v11, %v2459_v23  ;;  %v2476_v23 = vrot.slane %v4830_v40, 3 }
  0x5c   : > { %v5043_v24 = vsel %vm2443_vm5, %v2446_v9, %v2449_v12  ;;  %v5050_v1 = vsel %vm2443_vm5, %v2449_v12, %v2453_v59  ;;  %v2457_v9 = vor.u32 %v2456_v3, %v2455_v42  ;;  %v5091_v12 = vld [vmem:[%s4672_s3 + $0x6] sm:$0x3]  ;;  %v5104_v44 = vsel %vm1899_vm4, %v1919_v22, %v1921_v7 }
  0x5d   : > { %v1923_v42 = vrot.slane %v4884_v37, 2  ;;  %v1925_v3 = vrot.slane %v4921_v19, 2 }
  0x5e   : > { %v5068_v62 = vsel %vm2443_vm5, %v2453_v59, %v2457_v9  ;;  %v5078_v52 = vsel %vm2443_vm5, %v2457_v9, %v2461_v51  ;;  %v2475_v9 = vrot.slane %v4833_v41, 2  ;;  %v1927_v41 = vrot.slane %v4929_v54, 2 }
  0x5f   : > { %3814 = vmatmul.mubr.msk.bf16.gmra.mrb[28].mxu1 %vm543_vm3, %v526_v31  ;;  %v2467_v31 = vrot.slane %v4805_v20, 2  ;;  %v2471_v20 = vrot.slane %v4826_v36, 2  ;;  %v5127_v33 = vsel %vm1899_vm4, %v1921_v7, %v1923_v42  ;;  %v1931_v7 = vrot.slane %v4867_v15, 2 }
  0x60   : > { %3817 = vmatprep.mubr.msk.bf16.mxu1 %vm543_vm3, %v534_v13  ;;  %v2468_v13 = vrot.slane %v4796_v16, 3  ;;  %v5129_v36 = vor.u32 %v2476_v23, %v2475_v9  ;;  %v5294_v9 = vld [vmem:[%s4667_s28 + $0xa0] ss:$0 sps:$4 sm:$0xff]   ;;  %v1017_v23 = vrot.slane %v4815_v26, 1 }
  0x62   : > { %3984 = vmatmul.mubr.msk.bf16.gmra.mrb[8].mxu0 %vm543_vm3, %v5040_v28  ;;  %v2469_v59 = vor.u32 %v2468_v13, %v2467_v31  ;;  %v5174_v31 = vsel %vm1899_vm4, %v1931_v7, %v5002_v46 }
  0x63   : > { %3987 = vmatprep.mubr.msk.bf16.mxu0 %vm543_vm3, %v5047_v56 }
  0x67   : > { %3818 = vmatmul.mubr.msk.bf16.gmra.mrb[32].mxu1 %vm543_vm3, %v4932_v8  ;;  %v2464_v8 = vrot.slane %v4782_v63, 3  ;;  %v5099_v63 = vsel %vm1899_vm4, %v1917_v47, %v1919_v22  ;;  %v2473_v47 = vor.u32 %v2472_v39, %v2471_v20  ;;  %v5197_v20 = vld [vmem:[%s4672_s3 + $0x10] sm:$0x3]  ;;  %v1013_v39 = vrot.slane %v4777_v60, 1 }
  0x68   : > { %3823 = vmatprep.mubr.msk.bf16.mxu1 %vm543_vm3, %v4687_v4 }
  0x69   : > { %v2465_v27 = vor.u32 %v2464_v8, %v2463_v55  ;;  %v5122_v11 = vsel %vm2443_vm5, %v2469_v59, %v2473_v47  ;;  %v5138_v40 = vsel %vm2443_vm5, %v2473_v47, %v5129_v36  ;;  %v1929_v55 = vrot.slane %v4959_v45, 2 }
  0x6a   : > { %3988 = vmatmul.mubr.msk.bf16.gmra.mrb[12].mxu0 %vm543_vm3, %v5065_v25  ;;  %v5149_v8 = vsel %vm1899_vm4, %v1925_v3, %v1927_v41 }
  0x6b   : > { %3991 = vmatprep.mubr.msk.bf16.mxu0 %vm543_vm3, %v5073_v50  ;;  %v5094_v10 = vsel %vm2443_vm5, %v2461_v51, %v2465_v27  ;;  %v5109_v16 = vsel %vm2443_vm5, %v2465_v27, %v2469_v59  ;;  %v5134_v51 = vsel %vm1899_vm4, %v1923_v42, %v1925_v3  ;;  %v5154_v22 = vsel %vm1899_vm4, %v1927_v41, %v1929_v55 }
  0x6c   : > { %v5164_v27 = vsel %vm1899_vm4, %v1929_v55, %v1931_v7  ;;  %v2584_v59 = vsel %vm598_vm0, %v4973_v38, 0  ;;  %v998_v38 = vrot.slane %v4687_v4, 1  ;;  %v1003_v4 = vrot.slane %v4709_v14, 1 }
  0x6d   : > { %v1015_v42 = vrot.slane %v4808_v21, 1  ;;  %v1023_v7 = vrot.slane %v4884_v37, 1 }
  0x6f   : > { %3824 = vmatmul.mubr.msk.bf16.vlgmr.msra.gmra.mrb[0].mxu1 %vm543_vm3, %v4690_v5  ;;  %v5289_v47 = vsel %vm997_vm6, %v1013_v39, %v1015_v42  ;;  %v5306_v41 = vsel %vm997_vm6, %v1015_v42, %v1017_v23 }
  0x70   : > { %3827 = vmatprep.mubr.msk.bf16.mxu1 %vm543_vm3, %v4694_v6  ;;  %3860 = vmatpush3.bf16.msra.mxu1 %v1090_v30  ;;  %v5168_v30 = vcombine.low %v4978_v57, %v4978_v57 }
  0x71   : > { %4418 = vmatprep.subr.msk.bf16.mxu1 %vm598_vm0, %v5091_v12 }
  0x72   : > { %3992 = vmatmul.mubr.msk.bf16.gmra.mrb[16].mxu0 %vm543_vm3, %v5099_v63  ;;  %v1935_v13 = vrot.slane %v5168_v30, 2 }
  0x73   : > { %3995 = vmatprep.mubr.msk.bf16.mxu0 %vm543_vm3, %v5104_v44 }
  0x74   : > { %v1936_v57 = vsel %vm1899_vm4, %v5002_v46, %v1935_v13  ;;  %v999_v46 = vrot.slane %v4690_v5, 1  ;;  %v2894_v13 = vsel %vm598_vm0, %v5197_v20, 0 }
  0x77   : > { %3828 = vmatmul.mubr.msk.bf16.gmra.mrb[4].mxu1 %vm543_vm3, %v4709_v14 }
  0x78   : > { %3831 = vmatprep.mubr.msk.bf16.mxu1 %vm543_vm3, %v4724_v29 }
  0x7a   : > { %3996 = vmatmul.mubr.msk.bf16.gmra.mrb[20].mxu0 %vm543_vm3, %v5127_v33 }
  0x7b   : > { %3999 = vmatprep.mubr.msk.bf16.mxu0 %vm543_vm3, %v5134_v51 }
  0x7f   : > { %3832 = vmatmul.mubr.msk.bf16.gmra.mrb[8].mxu1 %vm543_vm3, %v4730_v34 }
  0x80   : > { %3835 = vmatprep.mubr.msk.bf16.mxu1 %vm543_vm3, %v4733_v35 }
  0x82   : > { %4000 = vmatmul.mubr.msk.bf16.gmra.mrb[24].mxu0 %vm543_vm3, %v5149_v8 }
  0x83   : > { %4003 = vmatprep.mubr.msk.bf16.mxu0 %vm543_vm3, %v5154_v22 }
  0x87   : > { %3836 = vmatmul.mubr.msk.bf16.gmra.mrb[12].mxu1 %vm543_vm3, %v4754_v48 }
  0x88   : > { %3839 = vmatprep.mubr.msk.bf16.mxu1 %vm543_vm3, %v4777_v60 }
  0x8a   : > { %4004 = vmatmul.mubr.msk.bf16.gmra.mrb[28].mxu0 %vm543_vm3, %v5164_v27 }
  0x8b   : > { %4007 = vmatprep.mubr.msk.bf16.mxu0 %vm543_vm3, %v5174_v31 }
  0x8f   : > { %3840 = vmatmul.mubr.msk.bf16.gmra.mrb[16].mxu1 %vm543_vm3, %v4808_v21 }
  0x90   : > { %3843 = vmatprep.mubr.msk.bf16.mxu1 %vm543_vm3, %v4815_v26 }
  0x92   : > { %4008 = vmatmul.mubr.msk.bf16.gmra.mrb[32].mxu0 %vm543_vm3, %v1936_v57  ;;  %v1025_v57 = vrot.slane %v4921_v19, 1 }
  0x93   : > { %4013 = vmatprep.mubr.msk.bf16.mxu0 %vm543_vm3, %v4955_v17  ;;  %v1001_v17 = vrot.slane %v4694_v6, 1 }
  0x95   : > { %v5234_v5 = vsel %vm997_vm6, %v999_v46, %v1001_v17 }
  0x97   : > { %3844 = vmatmul.mubr.msk.bf16.gmra.mrb[20].mxu1 %vm543_vm3, %v4845_v53 }
  0x98   : > { %3847 = vmatprep.mubr.msk.bf16.mxu1 %vm543_vm3, %v4871_v18 }
  0x9a   : > { %4014 = vmatmul.mubr.msk.bf16.vlgmr.msra.gmra.mrb[0].mxu0 %vm543_vm3, %v4965_v49  ;;  %v1000_v49 = vsel %vm997_vm6, %v998_v38, %v999_v46 }
  0x9b   : > { %4050 = vmatpush3.bf16.msra.mxu0 %v2584_v59  ;;  %4017 = vmatprep.mubr.msk.bf16.mxu0 %vm543_vm3, %v5007_v2  ;;  %v1324_v2 = vsel %vm598_vm0, %v5091_v12, 0  ;;  %v1011_v12 = vrot.slane %v4754_v48, 1  ;;  %v1027_v59 = vrot.slane %v4929_v54, 1 }
  0x9c   : > { %4424 = vmatprep.subr.msk.bf16.mxu0 %vm598_vm0, %v5197_v20  ;;  %v1029_v20 = vrot.slane %v4959_v45, 1 }
  0x9d   : > { %v5286_v3 = vsel %vm997_vm6, %v1011_v12, %v1013_v39  ;;  %v5345_v38 = vsel %vm997_vm6, %v1025_v57, %v1027_v59  ;;  %v5718_v39 = vld [vmem:[#allocation9_spill] sm:$0xff] }
  0x9e   : > { %v2484_v42 = vrot.slane %v5718_v39, 3 }
  0x9f   : > { %3848 = vmatmul.mubr.msk.bf16.gmra.mrb[24].mxu1 %vm543_vm3, %v4884_v37 }
  0xa0   : > { %3851 = vmatprep.mubr.msk.bf16.mxu1 %vm543_vm3, %v4921_v19 }
  0xa2   : > { %4018 = vmatmul.mubr.msk.bf16.gmra.mrb[4].mxu0 %vm543_vm3, %v5018_v58  ;;  %v5237_v58 = vsel %vm997_vm6, %v1001_v17, %v1003_v4 }
  0xa3   : > { %4021 = vmatprep.mubr.msk.bf16.mxu0 %vm543_vm3, %v5040_v28  ;;  %v1005_v28 = vrot.slane %v4724_v29, 1 }
  0xa7   : > { %3852 = vmatmul.mubr.msk.bf16.gmra.mrb[28].mxu1 %vm543_vm3, %v4929_v54 }
  0xa8   : > { %3855 = vmatprep.mubr.msk.bf16.mxu1 %vm543_vm3, %v4959_v45 }
  0xaa   : > { %4022 = vmatmul.mubr.msk.bf16.gmra.mrb[8].mxu0 %vm543_vm3, %v5047_v56  ;;  %v1007_v56 = vrot.slane %v4730_v34, 1 }
  0xab   : > { %4025 = vmatprep.mubr.msk.bf16.mxu0 %vm543_vm3, %v5065_v25  ;;  %v5254_v25 = vsel %vm997_vm6, %v1003_v4, %v1005_v28  ;;  %v5715_v4 = vld [vmem:[#allocation8_spill] sm:$0xff] }
  0xaf   : > { %3856 = vmatmul.mubr.msk.bf16.gmra.mrb[32].mxu1 %vm543_vm3, %v4867_v15 }
  0xb0   : > { %3861 = vmatprep.mubr.msk.bf16.mxu1 %vm543_vm3, %v1000_v49  ;;  %v5714_v49 = vld [vmem:[#allocation11_spill] sm:$0xff] }
  0xb1   : > { %v1033_v17 = vrot.slane %v5714_v49, 1  ;;  %v5725_v49 = vld [vmem:[#allocation18_spill] sm:$0xff] }
  0xb2   : > { %4026 = vmatmul.mubr.msk.bf16.gmra.mrb[12].mxu0 %vm543_vm3, %v5073_v50  ;;  %v5257_v50 = vsel %vm997_vm6, %v1005_v28, %v1007_v56 }
  0xb3   : > { %4029 = vmatprep.mubr.msk.bf16.mxu0 %vm543_vm3, %v5099_v63 }
  0xb7   : > { %3862 = vmatmul.mubr.msk.bf16.vlgmr.msra.gmra.mrb[0].mxu1 %vm543_vm3, %v5234_v5 }
  0xb8   : > { %3865 = vmatprep.mubr.msk.bf16.mxu1 %vm543_vm3, %v5237_v58  ;;  %3898 = vmatpush3.bf16.msra.mxu1 %v1324_v2  ;;  %v5716_v2 = vld [vmem:[#allocation7_spill] sm:$0xff] }
  0xb9   : > { %4420 = vmatprep.subr.msk.bf16.mxu1 %vm598_vm0, %v4675_v0  ;;  %v1009_v0 = vrot.slane %v4733_v35, 1  ;;  %v2480_v28 = vrot.slane %v5716_v2, 3 }
  0xba   : > { %4030 = vmatmul.mubr.msk.bf16.gmra.mrb[16].mxu0 %vm543_vm3, %v5104_v44 }
  0xbb   : > { %4033 = vmatprep.mubr.msk.bf16.mxu0 %vm543_vm3, %v5127_v33  ;;  %v5270_v63 = vsel %vm997_vm6, %v1007_v56, %v1009_v0  ;;  %v5273_v44 = vsel %vm997_vm6, %v1009_v0, %v1011_v12  ;;  %v1019_v33 = vrot.slane %v4845_v53, 1  ;;  %v5717_v0 = vld [vmem:[#allocation13_spill] sm:$0xff] }
  0xbc   : > { %v2483_v12 = vrot.slane %v5717_v0, 2 }
  0xbd   : > { %v5309_v55 = vsel %vm997_vm6, %v1017_v23, %v1019_v33 }
  0xbf   : > { %3866 = vmatmul.mubr.msk.bf16.gmra.mrb[4].mxu1 %vm543_vm3, %v5254_v25 }
  0xc0   : > { %3869 = vmatprep.mubr.msk.bf16.mxu1 %vm543_vm3, %v5257_v50 }
  0xc2   : > { %4034 = vmatmul.mubr.msk.bf16.gmra.mrb[20].mxu0 %vm543_vm3, %v5134_v51  ;;  %v2217_v51 = vrot.slane %v5294_v9, 2 }
  0xc3   : > { %4037 = vmatprep.mubr.msk.bf16.mxu0 %vm543_vm3, %v5149_v8  ;;  %v5713_v8 = vrot.slane %v4988_v32, 2 }
  0xc7   : > { %3870 = vmatmul.mubr.msk.bf16.gmra.mrb[8].mxu1 %vm543_vm3, %v5270_v63 }
  0xc8   : > { %3873 = vmatprep.mubr.msk.bf16.mxu1 %vm543_vm3, %v5273_v44 }
  0xca   : > { %4038 = vmatmul.mubr.msk.bf16.gmra.mrb[24].mxu0 %vm543_vm3, %v5154_v22  ;;  %v2218_v22 = vsel %vm1899_vm4, %v5713_v8, %v2217_v51  ;;  %v5720_v51 = vld [vmem:[#allocation14_spill] sm:$0xff]  ;;  %v2485_v8 = vor.u32 %v2484_v42, %v2483_v12  ;;  %v5728_v12 = vld [vmem:[#allocation12_spill] sm:$0xff] }
  0xcb   : > { %4041 = vmatprep.mubr.msk.bf16.mxu0 %vm543_vm3, %v5164_v27  ;;  %v2503_v42 = vrot.slane %v5728_v12, 2 }
  0xcf   : > { %3874 = vmatmul.mubr.msk.bf16.gmra.mrb[12].mxu1 %vm543_vm3, %v5286_v3 }
  0xd0   : > { %3877 = vmatprep.mubr.msk.bf16.mxu1 %vm543_vm3, %v5289_v47 }
  0xd2   : > { %4042 = vmatmul.mubr.msk.bf16.gmra.mrb[28].mxu0 %vm543_vm3, %v5174_v31 }
  0xd3   : > { %4045 = vmatprep.mubr.msk.bf16.mxu0 %vm543_vm3, %v5014_v61  ;;  %v1021_v61 = vrot.slane %v4871_v18, 1 }
  0xd5   : > { %v5324_v27 = vsel %vm997_vm6, %v1019_v33, %v1021_v61  ;;  %v5327_v31 = vsel %vm997_vm6, %v1021_v61, %v1023_v7 }
  0xd7   : > { %3878 = vmatmul.mubr.msk.bf16.gmra.mrb[16].mxu1 %vm543_vm3, %v5306_v41 }
  0xd8   : > { %3881 = vmatprep.mubr.msk.bf16.mxu1 %vm543_vm3, %v5309_v55 }
  0xda   : > { %4046 = vmatmul.mubr.msk.bf16.gmra.mrb[32].mxu0 %vm543_vm3, %v2218_v22 }
  0xdb   : > { %4051 = vmatprep.mubr.msk.bf16.mxu0 %vm543_vm3, %v5043_v24  ;;  %v5342_v24 = vsel %vm997_vm6, %v1023_v7, %v1025_v57 }
  0xdf   : > { %3882 = vmatmul.mubr.msk.bf16.gmra.mrb[20].mxu1 %vm543_vm3, %v5324_v27 }
  0xe0   : > { %3885 = vmatprep.mubr.msk.bf16.mxu1 %vm543_vm3, %v5327_v31 }
  0xe2   : > { %4052 = vmatmul.mubr.msk.bf16.vlgmr.msra.gmra.mrb[0].mxu0 %vm543_vm3, %v5050_v1  ;;  %v5353_v1 = vrot.slane %v4867_v15, 1 }
  0xe3   : > { %4088 = vmatpush3.bf16.msra.mxu0 %v2894_v13  ;;  %4055 = vmatprep.mubr.msk.bf16.mxu0 %vm543_vm3, %v5068_v62  ;;  %v5360_v62 = vsel %vm997_vm6, %v1027_v59, %v1029_v20  ;;  %v5722_v13 = vld [vmem:[#allocation15_spill] sm:$0xff]  ;;  %v5723_v59 = vld [vmem:[#allocation6_spill] sm:$0xff] }
  0xe4   : > { %v5364_v46 = vsel %vm997_vm6, %v1029_v20, %v5353_v1 }
  0xe7   : > { %3886 = vmatmul.mubr.msk.bf16.gmra.mrb[24].mxu1 %vm543_vm3, %v5342_v24 }
  0xe8   : > { %3889 = vmatprep.mubr.msk.bf16.mxu1 %vm543_vm3, %v5345_v38 }
  0xea   : > { %4056 = vmatmul.mubr.msk.bf16.gmra.mrb[4].mxu0 %vm543_vm3, %v5078_v52  ;;  %v2479_v52 = vrot.slane %v5715_v4, 2 }
  0xeb   : > { %4059 = vmatprep.mubr.msk.bf16.mxu0 %vm543_vm3, %v5094_v10  ;;  %v1034_v10 = vsel %vm997_vm6, %v5353_v1, %v1033_v17  ;;  %v2496_v17 = vrot.slane %v5725_v49, 3 }
  0xec   : > { %v2481_v56 = vor.u32 %v2480_v28, %v2479_v52  ;;  %v5727_v28 = vld [vmem:[#allocation20_spill] sm:$0xff] }
  0xee   : > { %v2482_v23 = vsel %vm2443_vm5, %v5129_v36, %v2481_v56  ;;  %v2486_v61 = vsel %vm2443_vm5, %v2481_v56, %v2485_v8  ;;  %v2492_v36 = vrot.slane %v5722_v13, 3 }
  0xef   : > { %3890 = vmatmul.mubr.msk.bf16.gmra.mrb[28].mxu1 %vm543_vm3, %v5360_v62 }
  0xf0   : > { %3893 = vmatprep.mubr.msk.bf16.mxu1 %vm543_vm3, %v5364_v46 }
  0xf2   : > { %4060 = vmatmul.mubr.msk.bf16.gmra.mrb[8].mxu0 %vm543_vm3, %v5109_v16  ;;  %v5719_v16 = vld [vmem:[#allocation16_spill] sm:$0xff] }
  0xf3   : > { %4063 = vmatprep.mubr.msk.bf16.mxu0 %vm543_vm3, %v5122_v11  ;;  %v2487_v33 = vrot.slane %v5719_v16, 2  ;;  %v2488_v11 = vrot.slane %v5720_v51, 3 }
  0xf5   : > { %v2489_v22 = vor.u32 %v2488_v11, %v2487_v33  ;;  %v5729_v33 = vld [vmem:[#allocation19_spill] sm:$0xff] }
  0xf6   : > { %v1610_v11 = vshrl.u32 %v5729_v33, 16 }
  0xf7   : > { %3894 = vmatmul.mubr.msk.bf16.gmra.mrb[32].mxu1 %vm543_vm3, %v1034_v10  ;;  %v2490_v57 = vsel %vm2443_vm5, %v2485_v8, %v2489_v22  ;;  %v2500_v10 = vrot.slane %v5727_v28, 3  ;;  %v1613_v8 = vshll.u32 %v5729_v33, 16 }
  0xf8   : > { %3899 = vmatprep.mubr.msk.bf16.mxu1 %vm543_vm3, %v5234_v5  ;;  %v5721_v5 = vld [vmem:[#allocation17_spill] sm:$0xff] }
  0xf9   : > { %v2491_v7 = vrot.slane %v5721_v5, 2 }
  0xfa   : > { %4064 = vmatmul.mubr.msk.bf16.gmra.mrb[12].mxu0 %vm543_vm3, %v5138_v40  ;;  %v5724_v40 = vld [vmem:[#allocation21_spill] sm:$0xff] }
  0xfb   : > { %4067 = vmatprep.mubr.msk.bf16.mxu0 %vm543_vm3, %v2482_v23  ;;  %v2495_v20 = vrot.slane %v5724_v40, 2  ;;  %v2504_v23 = vrot.slane %v4887_v43, 3 }
  0xfd   : > { %v2497_v4 = vor.u32 %v2496_v17, %v2495_v20 }
  0xff   : > { %3900 = vmatmul.mubr.msk.bf16.vlgmr.msra.gmra.mrb[0].mxu1 %vm543_vm3, %v5237_v58  ;;  %v2493_v58 = vor.u32 %v2492_v36, %v2491_v7  ;;  %v2507_v36 = vrot.slane %v1610_v11, 2 }
 0x100   : > { %3903 = vmatprep.mubr.msk.bf16.mxu1 %vm543_vm3, %v5254_v25  ;;  %4126 = vmatpush3.bf16.msra.mxu1 %v5723_v59  ;;  %v5726_v25 = vld [vmem:[#allocation22_spill] sm:$0xff] }
 0x101   : > { %v2494_v52 = vsel %vm2443_vm5, %v2489_v22, %v2493_v58  ;;  %v2499_v2 = vrot.slane %v5726_v25, 2  ;;  %v2498_v56 = vsel %vm2443_vm5, %v2493_v58, %v2497_v4  ;;  %v2505_v22 = vor.u32 %v2504_v23, %v2503_v42 }
 0x102   : > { %4068 = vmatmul.mubr.msk.bf16.gmra.mrb[16].mxu0 %vm543_vm3, %v2486_v61  ;;  %v2512_v61 = vshrl.u32 %v4988_v32, 16  ;;  %v2521_v58 = vshrl.u32 %v5294_v9, 16  ;;  %v2802_v23 = vrot.slane %v4694_v6, 3  ;;  %v2807_v6 = vrot.slane %v4730_v34, 3 }
 0x103   : > { %4071 = vmatprep.mubr.msk.bf16.mxu0 %vm543_vm3, %v2490_v57  ;;  %v2508_v57 = vrot.slane %v1613_v8, 3 }
 0x104   : > { %v2514_v20 = vrot.slane %v2512_v61, 2  ;;  %v1585_v61 = vrot.slane %v5717_v0, 1  ;;  %v2819_v0 = vrot.slane %v4845_v53, 3 }
 0x107   : > { %3904 = vmatmul.mubr.msk.bf16.gmra.mrb[4].mxu1 %vm543_vm3, %v5257_v50  ;;  %v2501_v50 = vor.u32 %v2500_v10, %v2499_v2 }
 0x108   : > { %3907 = vmatprep.mubr.msk.bf16.mxu1 %vm543_vm3, %v5270_v63  ;;  %v2515_v63 = vshll.u32 %v4988_v32, 16 }
 0x109   : > { %v2502_v7 = vsel %vm2443_vm5, %v2497_v4, %v2501_v50  ;;  %v2506_v59 = vsel %vm2443_vm5, %v2501_v50, %v2505_v22  ;;  %v2524_v4 = vshll.u32 %v5294_v9, 16  ;;  %v2803_v50 = vrot.slane %v4709_v14, 3 }
 0x10a   : > { %4072 = vmatmul.mubr.msk.bf16.gmra.mrb[20].mxu0 %vm543_vm3, %v2494_v52  ;;  %v2517_v17 = vrot.slane %v2515_v63, 3  ;;  %v1586_v63 = vrot.slane %v5718_v39, 2  ;;  %v1590_v39 = vrot.slane %v5720_v51, 2 }
 0x10b   : > { %4075 = vmatprep.mubr.msk.bf16.mxu0 %vm543_vm3, %v2498_v56  ;;  %v2526_v10 = vrot.slane %v2524_v4, 3  ;;  %v1598_v4 = vrot.slane %v5725_v49, 2 }
 0x10c   : > { %v2518_v52 = vor.u32 %v2517_v17, %v2514_v20  ;;  %v1593_v20 = vrot.slane %v5721_v5, 1  ;;  %v1594_v17 = vrot.slane %v5722_v13, 2  ;;  %v2823_v5 = vrot.slane %v4884_v37, 3 }
 0x10d   : > { %v1597_v13 = vrot.slane %v5724_v40, 1  ;;  %v2825_v40 = vrot.slane %v4921_v19, 3 }
 0x10f   : > { %3908 = vmatmul.mubr.msk.bf16.gmra.mrb[8].mxu1 %vm543_vm3, %v5273_v44  ;;  %v2509_v44 = vor.u32 %v2508_v57, %v2507_v36  ;;  %v1587_v36 = vor.u32 %v1586_v63, %v1585_v61  ;;  %v5730_v57 = vld [vmem:[#allocation10_spill] sm:$0xff]  ;;  %v2826_v19 = vsel %vm2801_vm7, %v2823_v5, %v2825_v40 }
 0x110   : > { %3911 = vmatprep.mubr.msk.bf16.mxu1 %vm543_vm3, %v5286_v3  ;;  %v2523_v3 = vrot.slane %v2521_v58, 2  ;;  %v1595_v58 = vor.u32 %v1594_v17, %v1593_v20 }
 0x111   : > { %v2510_v2 = vsel %vm2443_vm5, %v2505_v22, %v2509_v44  ;;  %v2519_v56 = vsel %vm2443_vm5, %v2509_v44, %v2518_v52  ;;  %v2805_v22 = vrot.slane %v4724_v29, 3  ;;  %v2811_v29 = vrot.slane %v4754_v48, 3 }
 0x112   : > { %4076 = vmatmul.mubr.msk.bf16.gmra.mrb[24].mxu0 %vm543_vm3, %v2502_v7  ;;  %v2527_v42 = vor.u32 %v2526_v10, %v2523_v3  ;;  %v2815_v48 = vrot.slane %v4808_v21, 3  ;;  %v2817_v21 = vrot.slane %v4815_v26, 3  ;;  %v1602_v3 = vrot.slane %v5727_v28, 2 }
 0x113   : > { %4079 = vmatprep.mubr.msk.bf16.mxu0 %vm543_vm3, %v2506_v59  ;;  %v2806_v14 = vsel %vm2801_vm7, %v2803_v50, %v2805_v22  ;;  %v1588_v59 = vsel %vm1541_vm2, %v5730_v57, %v1587_v36  ;;  %v1605_v28 = vrot.slane %v5728_v12, 1  ;;  %v1619_v12 = vshrl.u32 %v5168_v30, 16 }
 0x114   : > { %v2818_v44 = vsel %vm2801_vm7, %v2815_v48, %v2817_v21  ;;  %v2820_v26 = vsel %vm2801_vm7, %v2817_v21, %v2819_v0 }
 0x117   : > { %3912 = vmatmul.mubr.msk.bf16.gmra.mrb[12].mxu1 %vm543_vm3, %v5289_v47  ;;  %v2528_v47 = vsel %vm2443_vm5, %v2518_v52, %v2527_v42  ;;  %v1606_v42 = vrot.slane %v4887_v43, 2  ;;  %v1622_v43 = vshll.u32 %v5168_v30, 16 }
 0x118   : > { %3915 = vmatprep.mubr.msk.bf16.mxu1 %vm543_vm3, %v5306_v41  ;;  %v2804_v41 = vsel %vm2801_vm7, %v2802_v23, %v2803_v50  ;;  %v1612_v50 = vrot.slane %v1610_v11, 1  ;;  %v2829_v11 = vrot.slane %v4959_v45, 3  ;;  %v2833_v45 = vrot.slane %v5729_v33, 3 }
 0x11a   : > { %4080 = vmatmul.mubr.msk.bf16.gmra.mrb[28].mxu0 %vm543_vm3, %v2510_v2  ;;  %v1601_v2 = vrot.slane %v5726_v25, 1  ;;  %v2827_v25 = vrot.slane %v4929_v54, 3 }
 0x11b   : > { %4083 = vmatprep.mubr.msk.bf16.mxu0 %vm543_vm3, %v2519_v56  ;;  %v1599_v56 = vor.u32 %v1598_v4, %v1597_v13 }
 0x11c   : > { %v1603_v37 = vor.u32 %v1602_v3, %v1601_v2  ;;  %v2828_v54 = vsel %vm2801_vm7, %v2825_v40, %v2827_v25 }
 0x11d   : > { %v1600_v49 = vsel %vm1541_vm2, %v1595_v58, %v1599_v56 }
 0x11e   : > { %v1604_v23 = vsel %vm1541_vm2, %v1599_v56, %v1603_v37 }
 0x11f   : > { %3916 = vmatmul.mubr.msk.bf16.gmra.mrb[16].mxu1 %vm543_vm3, %v5309_v55  ;;  %v2808_v55 = vsel %vm2801_vm7, %v2805_v22, %v2807_v6 }
 0x120   : > { %3919 = vmatprep.mubr.msk.bf16.mxu1 %vm543_vm3, %v5324_v27  ;;  %v2809_v27 = vrot.slane %v4733_v35, 3  ;;  %v2813_v35 = vrot.slane %v4777_v60, 3  ;;  %v1315_v60 = vrot.slane %v5168_v30, 1 }
 0x122   : > { %4084 = vmatmul.mubr.msk.bf16.gmra.mrb[32].mxu0 %vm543_vm3, %v2528_v47  ;;  %v2810_v34 = vsel %vm2801_vm7, %v2807_v6, %v2809_v27  ;;  %v2816_v7 = vsel %vm2801_vm7, %v2813_v35, %v2815_v48  ;;  %v1615_v47 = vrot.slane %v1613_v8, 2  ;;  %v2831_v6 = vrot.slane %v4867_v15, 3 }
 0x123   : > { %4089 = vmatprep.mubr.msk.bf16.mxu0 %vm543_vm3, %v2804_v41  ;;  %v1607_v41 = vor.u32 %v1606_v42, %v1605_v28  ;;  %v2837_v48 = vrot.slane %v5294_v9, 3 }
 0x124   : > { %v1616_v22 = vor.u32 %v1615_v47, %v1612_v50  ;;  %v2832_v30 = vsel %vm2801_vm7, %v2829_v11, %v2831_v6 }
 0x125   : > { %v1608_v8 = vsel %vm1541_vm2, %v1603_v37, %v1607_v41 }
 0x127   : > { %3920 = vmatmul.mubr.msk.bf16.gmra.mrb[20].mxu1 %vm543_vm3, %v5327_v31  ;;  %v2812_v31 = vsel %vm2801_vm7, %v2809_v27, %v2811_v29  ;;  %v1617_v27 = vsel %vm1541_vm2, %v1607_v41, %v1616_v22 }
 0x128   : > { %3923 = vmatprep.mubr.msk.bf16.mxu1 %vm543_vm3, %v5342_v24  ;;  %v1313_v24 = vrot.slane %v5729_v33, 1 }
 0x12a   : > { %4090 = vmatmul.mubr.msk.bf16.vlgmr.msra.gmra.mrb[0].mxu0 %vm543_vm3, %v2806_v14  ;;  %v1621_v14 = vrot.slane %v1619_v12, 1 }
 0x12b   : > { %4093 = vmatprep.mubr.msk.bf16.mxu0 %vm543_vm3, %v2808_v55  ;;  %v1624_v55 = vrot.slane %v1622_v43, 2 }
 0x12f   : > { %3924 = vmatmul.mubr.msk.bf16.gmra.mrb[24].mxu1 %vm543_vm3, %v5345_v38  ;;  %v1314_v38 = vsel %vm997_vm6, %v5353_v1, %v1313_v24  ;;  %v1316_v1 = vsel %vm997_vm6, %v1313_v24, %v1315_v60  ;;  %v2834_v24 = vsel %vm2801_vm7, %v2831_v6, %v2833_v45 }
 0x130   : > { %3927 = vmatprep.mubr.msk.bf16.mxu1 %vm543_vm3, %v5360_v62  ;;  %v2814_v62 = vsel %vm2801_vm7, %v2811_v29, %v2813_v35  ;;  %v2830_v29 = vsel %vm2801_vm7, %v2827_v25, %v2829_v11 }
 0x132   : > { %4094 = vmatmul.mubr.msk.bf16.gmra.mrb[4].mxu0 %vm543_vm3, %v2810_v34  ;;  %v1625_v34 = vor.u32 %v1624_v55, %v1621_v14 }
 0x133   : > { %4097 = vmatprep.mubr.msk.bf16.mxu0 %vm543_vm3, %v2812_v31  ;;  %v2835_v31 = vrot.slane %v4988_v32, 3 }
 0x134   : > { %v1626_v15 = vsel %vm1541_vm2, %v1616_v22, %v1625_v34 }
 0x135   : > { %v2836_v35 = vsel %vm2801_vm7, %v2833_v45, %v2835_v31 }
 0x137   : > { %3928 = vmatmul.mubr.msk.bf16.gmra.mrb[28].mxu1 %vm543_vm3, %v5364_v46  ;;  %v1589_v46 = vrot.slane %v5719_v16, 1  ;;  %v2821_v16 = vrot.slane %v4871_v18, 3 }
 0x138   : > { %3931 = vmatprep.mubr.msk.bf16.mxu1 %vm543_vm3, %v1314_v38  ;;  %v2838_v38 = vsel %vm2801_vm7, %v2835_v31, %v2837_v48 }
 0x139   : > { %v1591_v53 = vor.u32 %v1590_v39, %v1589_v46  ;;  %v2822_v10 = vsel %vm2801_vm7, %v2819_v0, %v2821_v16  ;;  %v2824_v18 = vsel %vm2801_vm7, %v2821_v16, %v2823_v5 }
 0x13a   : > { %4098 = vmatmul.mubr.msk.bf16.gmra.mrb[8].mxu0 %vm543_vm3, %v2814_v62 }
 0x13b   : > { %4101 = vmatprep.mubr.msk.bf16.mxu0 %vm543_vm3, %v2816_v7  ;;  %v1592_v51 = vsel %vm1541_vm2, %v1587_v36, %v1591_v53  ;;  %v1596_v52 = vsel %vm1541_vm2, %v1591_v53, %v1595_v58 }
 0x13f   : > { %3932 = vmatmul.mubr.msk.bf16.gmra.mrb[32].mxu1 %vm543_vm3, %v1316_v1 }
 0x140   : > { %3957 = vmatprep.mubr.msk.bf16.mxu1 %vm543_vm3, %v1588_v59 }
 0x142   : > { %4102 = vmatmul.mubr.msk.bf16.gmra.mrb[12].mxu0 %vm543_vm3, %v2818_v44 }
 0x143   : > { %4105 = vmatprep.mubr.msk.bf16.mxu0 %vm543_vm3, %v2820_v26 }
 0x147   : > { %3958 = vmatmul.mubr.msk.bf16.vlgmr.msra.gmra.mrb[20].mxu1 %vm543_vm3, %v1592_v51 }
 0x148   : > { %3961 = vmatprep.mubr.msk.bf16.mxu1 %vm543_vm3, %v1596_v52 }
 0x14a   : > { %4106 = vmatmul.mubr.msk.bf16.gmra.mrb[16].mxu0 %vm543_vm3, %v2822_v10 }
 0x14b   : > { %4109 = vmatprep.mubr.msk.bf16.mxu0 %vm543_vm3, %v2824_v18 }
 0x14f   : > { %3962 = vmatmul.mubr.msk.bf16.gmra.mrb[24].mxu1 %vm543_vm3, %v1600_v49 }
 0x150   : > { %3965 = vmatprep.mubr.msk.bf16.mxu1 %vm543_vm3, %v1604_v23 }
 0x152   : > { %4110 = vmatmul.mubr.msk.bf16.gmra.mrb[20].mxu0 %vm543_vm3, %v2826_v19 }
 0x153   : > { %4113 = vmatprep.mubr.msk.bf16.mxu0 %vm543_vm3, %v2828_v54 }
 0x157   : > { %3966 = vmatmul.mubr.msk.bf16.gmra.mrb[28].mxu1 %vm543_vm3, %v1608_v8 }
 0x158   : > { %3969 = vmatprep.mubr.msk.bf16.mxu1 %vm543_vm3, %v1617_v27 }
 0x15a   : > { %4114 = vmatmul.mubr.msk.bf16.gmra.mrb[24].mxu0 %vm543_vm3, %v2830_v29 }
 0x15b   : > { %4117 = vmatprep.mubr.msk.bf16.mxu0 %vm543_vm3, %v2832_v30 }
 0x15f   : > { %3970 = vmatmul.mubr.msk.bf16.gmra.mrb[32].mxu1 %vm543_vm3, %v1626_v15 }
 0x162   : > { %4118 = vmatmul.mubr.msk.bf16.gmra.mrb[28].mxu0 %vm543_vm3, %v2834_v24 }
 0x163   : > { %4121 = vmatprep.mubr.msk.bf16.mxu0 %vm543_vm3, %v2836_v35 }
 0x16a   : > { %4122 = vmatmul.mubr.msk.bf16.gmra.mrb[32].mxu0 %vm543_vm3, %v2838_v38 }
 0x1d2   : > { %v3901_v33 = vpop.f32.mrb[0].mxu1 }
 0x1d3   : > { %v1360_v61 = vpop.f32.mrb[1].mxu1 }
 0x1d4   : > { %v3902_v63 = vpop.f32.mrb[2].mxu1 }
 0x1d5   : > { %v1363_v32 = vpop.f32.mrb[3].mxu1 }
 0x1da   : > { %v3905_v62 = vpop.f32.mrb[4].mxu1 }
 0x1db   : > { %v1376_v7 = vpop.f32.mrb[5].mxu1 }
 0x1dc   : > { %v3906_v60 = vpop.f32.mrb[6].mxu1 }
 0x1dd   : > { %v1379_v36 = vpop.f32.mrb[7].mxu1 }
 0x1e2   : > { %v3909_v21 = vpop.f32.mrb[8].mxu1 }
 0x1e3   : > { %v1392_v1 = vpop.f32.mrb[9].mxu1 }
 0x1e4   : > { %v3910_v0 = vpop.f32.mrb[10].mxu1 }
 0x1e5   : > { %v1395_v46 = vpop.f32.mrb[11].mxu1 }
 0x1ea   : > { %v3913_v39 = vpop.f32.mrb[12].mxu1 }
 0x1eb   : > { %v1408_v9 = vpop.f32.mrb[13].mxu1 }
 0x1ec   : > { %v3914_v57 = vpop.f32.mrb[14].mxu1 }
 0x1ed   : > { %v1411_v59 = vpop.f32.mrb[15].mxu1 }
 0x1f2   : > { %v3917_v20 = vpop.f32.mrb[16].mxu1 }
 0x1f3   : > { %v1424_v17 = vpop.f32.mrb[17].mxu1 }
 0x1f4   : > { %v5555_v44 = vpop.f32.mrb[18].mxu1 }
 0x1f5   : > { %v5557_v26 = vpop.f32.mrb[19].mxu1 }
 0x1fd   : > { %v4091_v53 = vpop.f32.mrb[0].mxu0 }
 0x1fe   : > { %v4127_v58 = vadd.f32 %v4091_v53, %v3901_v33  ;;  %v2930_v16 = vpop.f32.mrb[1].mxu0 }
 0x1ff   : > { %v4128_v51 = vadd.f32 %v2930_v16, %v1360_v61  ;;  %v4092_v5 = vpop.f32.mrb[2].mxu0 }
 0x200   : > { %3258 = vst [vmem:[%s5562_s6 + $0x10] sm:$0xff] %v4127_v58  ;;  %v4129_v13 = vadd.f32 %v4092_v5, %v3902_v63  ;;  %v2933_v4 = vpop.f32.mrb[3].mxu0 }
 0x201   : > { %3256 = vst [vmem:[%s5562_s6] sm:$0xff] %v4128_v51  ;;  %v4130_v52 = vadd.f32 %v2933_v4, %v1363_v32 }
 0x202   : > { %3259 = vst [vmem:[%s5562_s6 + $0x18] sm:$0xff] %v4129_v13 }
 0x203   : > { %3257 = vst [vmem:[%s5562_s6 + $0x8] sm:$0xff] %v4130_v52 }
 0x205   : > { %v4095_v2 = vpop.f32.mrb[4].mxu0 }
 0x206   : > { %v4131_v3 = vadd.f32 %v4095_v2, %v3905_v62  ;;  %v2946_v10 = vpop.f32.mrb[5].mxu0 }
 0x207   : > { %v4132_v18 = vadd.f32 %v2946_v10, %v1376_v7  ;;  %v4096_v56 = vpop.f32.mrb[6].mxu0 }
 0x208   : > { %3262 = vst [vmem:[%s5562_s6 + $0x30] sm:$0xff] %v4131_v3  ;;  %v4133_v37 = vadd.f32 %v4096_v56, %v3906_v60  ;;  %v2949_v40 = vpop.f32.mrb[7].mxu0 }
 0x209   : > { %3260 = vst [vmem:[%s5562_s6 + $0x20] sm:$0xff] %v4132_v18  ;;  %v4134_v49 = vadd.f32 %v2949_v40, %v1379_v36 }
 0x20a   : > { %3263 = vst [vmem:[%s5562_s6 + $0x38] sm:$0xff] %v4133_v37 }
 0x20b   : > { %3261 = vst [vmem:[%s5562_s6 + $0x28] sm:$0xff] %v4134_v49 }
 0x20d   : > { %v4099_v25 = vpop.f32.mrb[8].mxu0 }
 0x20e   : > { %v4135_v28 = vadd.f32 %v4099_v25, %v3909_v21  ;;  %v2962_v42 = vpop.f32.mrb[9].mxu0 }
 0x20f   : > { %v4136_v23 = vadd.f32 %v2962_v42, %v1392_v1  ;;  %v4100_v50 = vpop.f32.mrb[10].mxu0 }
 0x210   : > { %3266 = vst [vmem:[%s5562_s6 + $0x50] sm:$0xff] %v4135_v28  ;;  %v4137_v47 = vadd.f32 %v4100_v50, %v3910_v0  ;;  %v2965_v19 = vpop.f32.mrb[11].mxu0 }
 0x211   : > { %3264 = vst [vmem:[%s5562_s6 + $0x40] sm:$0xff] %v4136_v23  ;;  %v4138_v54 = vadd.f32 %v2965_v19, %v1395_v46 }
 0x212   : > { %3267 = vst [vmem:[%s5562_s6 + $0x58] sm:$0xff] %v4137_v47 }
 0x213   : > { %3265 = vst [vmem:[%s5562_s6 + $0x48] sm:$0xff] %v4138_v54 }
 0x215   : > { %v4103_v41 = vpop.f32.mrb[12].mxu0 }
 0x216   : > { %v4139_v12 = vadd.f32 %v4103_v41, %v3913_v39  ;;  %v2978_v43 = vpop.f32.mrb[13].mxu0 }
 0x217   : > { %v4140_v22 = vadd.f32 %v2978_v43, %v1408_v9  ;;  %v4104_v11 = vpop.f32.mrb[14].mxu0 }
 0x218   : > { %3270 = vst [vmem:[%s5562_s6 + $0x70] sm:$0xff] %v4139_v12  ;;  %v4141_v8 = vadd.f32 %v4104_v11, %v3914_v57  ;;  %v2981_v6 = vpop.f32.mrb[15].mxu0 }
 0x219   : > { %3268 = vst [vmem:[%s5562_s6 + $0x60] sm:$0xff] %v4140_v22  ;;  %v4142_v14 = vadd.f32 %v2981_v6, %v1411_v59 }
 0x21a   : > { %3271 = vst [vmem:[%s5562_s6 + $0x78] sm:$0xff] %v4141_v8  ;;  %v3959_v55 = vpop.f32.mrb[20].mxu1 }
 0x21b   : > { %3269 = vst [vmem:[%s5562_s6 + $0x68] sm:$0xff] %v4142_v14  ;;  %v1798_v27 = vpop.f32.mrb[21].mxu1 }
 0x21c   : > { %v3960_v29 = vpop.f32.mrb[22].mxu1 }
 0x21d   : > { %v4107_v30 = vpop.f32.mrb[16].mxu0  ;;  %v1801_v34 = vpop.f32.mrb[23].mxu1 }
 0x21e   : > { %v4143_v45 = vadd.f32 %v4107_v30, %v3917_v20  ;;  %v2994_v15 = vpop.f32.mrb[17].mxu0 }
 0x21f   : > { %v4144_v31 = vadd.f32 %v2994_v15, %v1424_v17  ;;  %v4108_v24 = vpop.f32.mrb[18].mxu0 }
 0x220   : > { %3274 = vst [vmem:[%s5562_s6 + $0x90] sm:$0xff] %v4143_v45  ;;  %v4145_v35 = vadd.f32 %v4108_v24, %v5555_v44  ;;  %v2997_v48 = vpop.f32.mrb[19].mxu0 }
 0x221   : > { %3272 = vst [vmem:[%s5562_s6 + $0x80] sm:$0xff] %v4144_v31  ;;  %v4146_v38 = vadd.f32 %v2997_v48, %v5557_v26 }
 0x222   : > { %3275 = vst [vmem:[%s5562_s6 + $0x98] sm:$0xff] %v4145_v35  ;;  %v3963_v33 = vpop.f32.mrb[24].mxu1 }
 0x223   : > { %3273 = vst [vmem:[%s5562_s6 + $0x88] sm:$0xff] %v4146_v38  ;;  %v1814_v61 = vpop.f32.mrb[25].mxu1 }
 0x224   : > { %v3964_v63 = vpop.f32.mrb[26].mxu1 }
 0x225   : > { %v4111_v32 = vpop.f32.mrb[20].mxu0  ;;  %v1817_v62 = vpop.f32.mrb[27].mxu1 }
 0x226   : > { %v4147_v7 = vadd.f32 %v4111_v32, %v3959_v55  ;;  %v3010_v60 = vpop.f32.mrb[21].mxu0 }
 0x227   : > { %v4148_v36 = vadd.f32 %v3010_v60, %v1798_v27  ;;  %v4112_v21 = vpop.f32.mrb[22].mxu0 }
 0x228   : > { %3278 = vst [vmem:[%s5562_s6 + $0xb0] sm:$0xff] %v4147_v7  ;;  %v4149_v1 = vadd.f32 %v4112_v21, %v3960_v29  ;;  %v3013_v0 = vpop.f32.mrb[23].mxu0 }
 0x229   : > { %3276 = vst [vmem:[%s5562_s6 + $0xa0] sm:$0xff] %v4148_v36  ;;  %v4150_v46 = vadd.f32 %v3013_v0, %v1801_v34 }
 0x22a   : > { %3279 = vst [vmem:[%s5562_s6 + $0xb8] sm:$0xff] %v4149_v1  ;;  %v3967_v39 = vpop.f32.mrb[28].mxu1 }
 0x22b   : > { %3277 = vst [vmem:[%s5562_s6 + $0xa8] sm:$0xff] %v4150_v46  ;;  %v1830_v9 = vpop.f32.mrb[29].mxu1 }
 0x22c   : > { %v3968_v57 = vpop.f32.mrb[30].mxu1 }
 0x22d   : > { %v4115_v59 = vpop.f32.mrb[24].mxu0  ;;  %v1833_v20 = vpop.f32.mrb[31].mxu1 }
 0x22e   : > { %v4151_v17 = vadd.f32 %v4115_v59, %v3963_v33  ;;  %v3026_v44 = vpop.f32.mrb[25].mxu0 }
 0x22f   : > { %v4152_v26 = vadd.f32 %v3026_v44, %v1814_v61  ;;  %v4116_v53 = vpop.f32.mrb[26].mxu0 }
 0x230   : > { %3282 = vst [vmem:[%s5562_s6 + $0xd0] sm:$0xff] %v4151_v17  ;;  %v4153_v58 = vadd.f32 %v4116_v53, %v3964_v63  ;;  %v3029_v16 = vpop.f32.mrb[27].mxu0 }
 0x231   : > { %3280 = vst [vmem:[%s5562_s6 + $0xc0] sm:$0xff] %v4152_v26  ;;  %v4154_v51 = vadd.f32 %v3029_v16, %v1817_v62 }
 0x232   : > { %3283 = vst [vmem:[%s5562_s6 + $0xd8] sm:$0xff] %v4153_v58  ;;  %v3971_v5 = vpop.f32.mrb[32].mxu1 }
 0x233   : > { %3281 = vst [vmem:[%s5562_s6 + $0xc8] sm:$0xff] %v4154_v51  ;;  %v1846_v13 = vpop.f32.mrb[33].mxu1 }
 0x234   : > { %v3972_v4 = vpop.f32.mrb[34].mxu1 }
 0x235   : > { %v4119_v52 = vpop.f32.mrb[28].mxu0  ;;  %v1849_v2 = vpop.f32.mrb[35].mxu1 }
 0x236   : > { %v4155_v3 = vadd.f32 %v4119_v52, %v3967_v39  ;;  %v3042_v10 = vpop.f32.mrb[29].mxu0 }
 0x237   : > { %v4156_v18 = vadd.f32 %v3042_v10, %v1830_v9  ;;  %v4120_v56 = vpop.f32.mrb[30].mxu0 }
 0x238   : > { %3286 = vst [vmem:[%s5562_s6 + $0xf0] sm:$0xff] %v4155_v3  ;;  %v4157_v37 = vadd.f32 %v4120_v56, %v3968_v57  ;;  %v3045_v40 = vpop.f32.mrb[31].mxu0 }
 0x239   : > { %3284 = vst [vmem:[%s5562_s6 + $0xe0] sm:$0xff] %v4156_v18  ;;  %v4158_v49 = vadd.f32 %v3045_v40, %v1833_v20 }
 0x23a   : > { %3287 = vst [vmem:[%s5562_s6 + $0xf8] sm:$0xff] %v4157_v37 }
 0x23b   : > { %3285 = vst [vmem:[%s5562_s6 + $0xe8] sm:$0xff] %v4158_v49 }
 0x23d   : > { %v4123_v25 = vpop.f32.mrb[32].mxu0 }
 0x23e   : > { %v4159_v28 = vadd.f32 %v4123_v25, %v3971_v5  ;;  %v3058_v42 = vpop.f32.mrb[33].mxu0 }
 0x23f   : > { %v4160_v23 = vadd.f32 %v3058_v42, %v1846_v13  ;;  %v4124_v50 = vpop.f32.mrb[34].mxu0 }
 0x240   : > { %3290 = vst [vmem:[%s5562_s6 + $0x110] sm:$0xff] %v4159_v28  ;;  %v4161_v47 = vadd.f32 %v4124_v50, %v3972_v4  ;;  %v3061_v19 = vpop.f32.mrb[35].mxu0 }
 0x241   : > { %3288 = vst [vmem:[%s5562_s6 + $0x100] sm:$0xff] %v4160_v23  ;;  %v4162_v54 = vadd.f32 %v3061_v19, %v1849_v2 }
 0x242   : > { %3291 = vst [vmem:[%s5562_s6 + $0x118] sm:$0xff] %v4161_v47 }
 0x243   : > { %3289 = vst [vmem:[%s5562_s6 + $0x108] sm:$0xff] %v4162_v54 }
 0x244   : > { %4522 = shalt.err (!%p4519_p5)
}
 0x245   : > { %s4523_s26 = scalar_lea.hbm %s5604_s18, 4608  ;;  %s4527_s29 = scalar_lea.hbm %s5661_s2, 9216 }
 0x246   : > { %p4524_p6 = scmp.ne.s32.totalorder %s5604_s18, %s4523_s26  ;;  %p4528_p10 = scmp.lt.u32.totalorder %s5604_s18, %s5661_s2 }
 0x247   : > { %p4529_p11 = scmp.lt.u32.totalorder %s4527_s29, %s4523_s26  ;;  %p4531_p13 = scmp.lt.u32.totalorder %s4523_s26, %s5604_s18 }
 0x248   : > { %p4525_p7 = pnand %p4524_p6, %p4647_p4 }
 0x249   : > { %p4530_p12 = por %p4529_p11, %p4528_p10 }
 0x24a   : > { %p4526_p9 = pneg %p4525_p7 }
 0x24b   : > { %p4532_p0 = por %p4531_p13, %p4530_p12 }
 0x24d   : > { %p4533_p1 = pnand %p4532_p0, %p4526_p9 }
 0x24f   : > { %4536 = shalt.err (!%p4533_p1)
}
 0x250   : > { %s4590_s4 = smov 128   ;;  %s4591_s5 = smov 8  }
 0x251   : > { %4429 = dma.vmem_to_hbm [thread:$0]  (%p4647_p4), %s5606_s8, 4608, %s5604_s18, %s5613_s12, %s4590_s4, %s4590_s4, %s4591_s5  }
 0x252 PF: > { %p4435_p2 = scmp.ge.s32.totalorder %s4587_s14, 2  ;;  %s3322_s6 = sand.u32 1, %s4567_s9  }
 0x253   : > { %s3323_s7 = scalar_lea.sflag [#allocation4], %s3322_s6 }
 0x254   : > { %p4432_p3 = pnand %p4435_p2, %p4654_p8 }
 0x256   : > { %4562 = dma.done.wait (!%p4432_p3), %s3323_s7, 4608  }
 0x257   : > { %4564 = vsyncadd (!%p4432_p3), %s3323_s7, 4294962688  ;;  %s15_s14 = sadd.s32 1, %s4587_s14   ;;  %s5731_s9 = smov %s4571_s10 }
 0x258   : > { %p12_p5 = scmp.ge.s32.totalorder %s15_s14, 4   ;;  %s5732_s10 = smov %s4575_s11 }
 0x259   : > { %s5733_s11 = smov %s4660_s22  ;;  %s5734_s12 = smov %s4583_s13 }
 0x25a   : > { %s5735_s13 = smov %s5737_s17  ;;  %14 = sbr.rel (!%p12_p5) target bundleno = 4 (0x4), region = 82 }
 0x261   :  { %3328 = vsyncpa [#allocation4], 1 }
 0x262   :  { %3330 = vsyncpa [#allocation4 + $0x1], 1 }

</bundles_post_ra>
